<compile_context>
chip_gen: v5e
topology: v5e:2x2
jax: 0.10.0
libtpu: 0.0.40
codegen_flags: <defaults>
</compile_context>

<pallas_src>
import functools
import math

import jax
import jax.numpy as jnp
from jax.experimental import pallas as pl
from jax.experimental.pallas import tpu as pltpu


def make_counts(amd0, kd=3):
    """Deterministically rebuild the module's `counts` buffer (reference only)."""
    hh = ww = int(math.sqrt(amd0))
    v = [[(hh + 2) * i + j for j in range(ww + 2)] for i in range(hh + 2)]
    rows = []
    for h in range(1, hh + 1):
        for w in range(1, ww + 1):
            rows.append([v[h - 1][w - 1], v[h - 1][w], v[h - 1][w + 1],
                         v[h][w - 1], v[h][w], v[h][w + 1],
                         v[h + 1][w - 1], v[h + 1][w], v[h + 1][w + 1]])
    return jnp.asarray(rows, dtype=jnp.int32)  # (amd0, kd*kd)


def _padded_block_bytes(block_shape, itemsize):
    """Approximate VMEM footprint of one buffer after (8,128) tile padding."""
    s = list(block_shape)
    s[-1] = -(-s[-1] // 128) * 128
    if len(s) >= 2:
        s[-2] = -(-s[-2] // 8) * 8
    n = 1
    for d in s:
        n *= d
    return n * itemsize


def _pick_band_rows(H, W, C, itemsize, kd=3, vmem_budget=20 << 20, max_rows=256):
    """Largest TH dividing H s.t. resident input + out buffers + intermediates fit."""
    in_bytes = 2 * _padded_block_bytes((1, H, W, C), itemsize)  # double-buffered input
    best = 1
    for th in range(1, min(H, max_rows) + 1):
        if H % th:
            continue
        out_b = _padded_block_bytes((1, th, W, kd * kd * C), itemsize)
        # ~2x out (double buffer) + ~3x out worth of in-kernel intermediates (slabs+band)
        if in_bytes + 5 * out_b <= vmem_budget:
            best = th
    return best


def _spatial_pool_kernel(x_ref, o_ref, *, H, W, C, TH):
    # x_ref: (1, H, W, C)       whole NHWC image of batch n (resident across bands)
    # o_ref: (1, TH, W, 9*C)    output band; channel layout = neighbor-major/channel-minor
    t = pl.program_id(1)
    row0 = t * TH
    if TH % 8 == 0:
        row0 = pl.multiple_of(row0, 8)

    # --- load TH+2 rows once; row clamping == ReplicationPad2d along H ---
    mid = x_ref[0, pl.ds(row0, TH), :, :]                                # rows g
    top_edge = x_ref[0, pl.ds(jnp.maximum(row0 - 1, 0), 1), :, :]        # row g0-1 (clamped)
    bot_edge = x_ref[0, pl.ds(jnp.minimum(row0 + TH, H - 1), 1), :, :]   # row gEnd+1 (clamped)
    if TH > 1:
        top = jnp.concatenate([top_edge, mid[:TH - 1]], axis=0)          # rows g-1 (clamped)
        bot = jnp.concatenate([mid[1:], bot_edge], axis=0)               # rows g+1 (clamped)
    else:
        top, bot = top_edge, bot_edge

    # --- column shifts, edge-replicated == ReplicationPad2d along W ---
    def shift_left(a):   # value at w-1
        return jnp.concatenate([a[:, :1, :], a[:, :-1, :]], axis=1)

    def shift_right(a):  # value at w+1
        return jnp.concatenate([a[:, 1:, :], a[:, -1:, :]], axis=1)

    # k = 3*i + j (i: top/mid/bot, j: left/center/right) matches the `counts` order.
    slabs = []
    for r in (top, mid, bot):
        slabs.extend((shift_left(r), r, shift_right(r)))

    # One coalesced store per band instead of 9 masked per-k channel-slice stores.
    band = jnp.concatenate(slabs, axis=2)                                # (TH, W, 9*C)
    o_ref[0, :, :, :] = band.astype(o_ref.dtype)


def spatial_pool(fm_nchw, kd=3, band_rows=None):
    """Pallas SpatialPool.forward. Input NCHW, output (N, H*W, kd*kd*C)."""
    if kd != 3:
        # The module's `counts` construction is only valid for kd=3.
        raise NotImplementedError("SpatialPool is only defined for kd=3")
    N, C, H, W = fm_nchw.shape
    KK = kd * kd

    # NCHW -> NHWC (same as the module's permute(0,2,3,1)); the replication pad is
    # fused into the kernel, so there is no jnp.pad / extra padded-array HBM pass.
    # TODO(synk): fuse this transpose into the kernel as well to drop one more HBM pass.
    x = jnp.transpose(fm_nchw, (0, 2, 3, 1))  # (N, H, W, C)

    isz = jnp.dtype(fm_nchw.dtype).itemsize
    TH = _pick_band_rows(H, W, C, isz, kd) if band_rows is None else int(band_rows)
    if H % TH != 0 or not (1 <= TH <= H):
        raise ValueError(f"band_rows={TH} must divide H={H}")

    kernel = functools.partial(_spatial_pool_kernel, H=H, W=W, C=C, TH=TH)

    in_block = _padded_block_bytes((1, H, W, C), isz)
    out_block = _padded_block_bytes((1, TH, W, KK * C), isz)
    vmem_limit = int(max(32 << 20, 2 * in_block + 6 * out_block + (2 << 20)))

    out4 = pl.pallas_call(
        kernel,
        out_shape=jax.ShapeDtypeStruct((N, H, W, KK * C), fm_nchw.dtype),
        grid=(N, H // TH),
        in_specs=[
            # Whole image of batch n; block index depends only on n so it is fetched
            # once per n and stays resident across the band axis.
            # TODO(synk): halo-tiled row-band input (manual DMA from pl.ANY) for very
            # large feature maps so the resident block stays well under v7x's 64 MiB VMEM.
            pl.BlockSpec((1, H, W, C), lambda n, t: (n, 0, 0, 0)),
        ],
        out_specs=pl.BlockSpec((1, TH, W, KK * C), lambda n, t: (n, t, 0, 0)),
        compiler_params=pltpu.CompilerParams(
            dimension_semantics=("parallel", "parallel"),  # disjoint outputs, no reduction
            vmem_limit_bytes=vmem_limit),
        cost_estimate=pl.CostEstimate(
            flops=0, transcendentals=0,
            bytes_accessed=int(N * H * W * C * isz * (1 + KK))),
    )(x)

    # Pure view: (N, H, W, 9C) -> (N, H*W, 9C) matches torch.cat's layout exactly.
    return out4.reshape(N, H * W, KK * C)


def spatial_pool_ref(fm_nchw, counts, kd=3):
    """Pure-JAX reference mirroring the PyTorch forward (pad + index_select + cat)."""
    N, C, H, W = fm_nchw.shape
    x = jnp.transpose(fm_nchw, (0, 2, 3, 1))
    xp = jnp.pad(x, ((0, 0), (1, 1), (1, 1), (0, 0)), mode="edge")
    flat = xp.reshape(N, (H + 2) * (W + 2), C)
    parts = [jnp.take(flat, counts[:, k], axis=1) for k in range(kd * kd)]
    return jnp.concatenate(parts, axis=2)


if __name__ == "__main__":
    # small shapes consistent with the module: amd0 = H*W = 256, kd = 3
    N, C, H, W = 2, 4, 16, 16
    kd = 3

    key = jax.random.PRNGKey(0)
    fm = jax.random.normal(key, (N, C, H, W), dtype=jnp.float32)

    counts = make_counts(H * W, kd)  # deterministic buffer from __init__
    ref = spatial_pool_ref(fm, counts, kd=kd)

    # default band selection (single band per batch element at this size)
    out = jax.block_until_ready(spatial_pool(fm, kd=kd))
    assert out.shape == (N, H * W, kd * kd * C), out.shape
    assert jnp.allclose(out, ref, atol=1e-6, rtol=1e-6), "mismatch vs reference"

    # explicit multi-band path (TH=8 -> 2 bands per batch element)
    out_banded = jax.block_until_ready(spatial_pool(fm, kd=kd, band_rows=8))
    assert jnp.allclose(out_banded, ref, atol=1e-6, rtol=1e-6), "mismatch vs reference (banded)"

    print("KERNEL_OK")
</pallas_src>

<mosaic_0001>
module attributes {stable_mosaic.version = 11 : i64} {
  func.func @_spatial_pool_kernel(%arg0: i32, %arg1: i32, %arg2: memref<1x16x16x4xf32, #tpu.memory_space<vmem>>, %arg3: memref<1x16x16x36xf32, #tpu.memory_space<vmem>>) attributes {dimension_semantics = [#tpu.dimension_semantics<parallel>, #tpu.dimension_semantics<parallel>], iteration_bounds = array<i64: 2, 1>, scalar_prefetch = 0 : i64, scratch_operands = 0 : i64, tpu.core_type = #tpu.core_type<tc>, window_params = [{transform_indices = @transform_0, window_bounds = array<i64: 1, 16, 16, 4>}, {transform_indices = @transform_1, window_bounds = array<i64: 1, 16, 16, 36>}]} {
    %c16_i32 = arith.constant 16 : i32
    %0 = arith.muli %arg1, %c16_i32 : i32
    %1 = tpu.assume_multiple %0, 8 : i32
    %c0 = arith.constant 0 : index
    %2 = arith.index_cast %1 : i32 to index
    %c0_0 = arith.constant 0 : index
    %c0_1 = arith.constant 0 : index
    %3 = vector.load %arg2[%c0, %2, %c0_0, %c0_1] : memref<1x16x16x4xf32, #tpu.memory_space<vmem>>, vector<1x16x16x4xf32>
    %4 = vector.shape_cast %3 : vector<1x16x16x4xf32> to vector<16x16x4xf32>
    %c1_i32 = arith.constant 1 : i32
    %5 = arith.subi %1, %c1_i32 : i32
    %c0_i32 = arith.constant 0 : i32
    %6 = arith.maxsi %5, %c0_i32 : i32
    %c0_2 = arith.constant 0 : index
    %7 = arith.index_cast %6 : i32 to index
    %c0_3 = arith.constant 0 : index
    %c0_4 = arith.constant 0 : index
    %8 = vector.load %arg2[%c0_2, %7, %c0_3, %c0_4] : memref<1x16x16x4xf32, #tpu.memory_space<vmem>>, vector<1x1x16x4xf32>
    %9 = vector.shape_cast %8 : vector<1x1x16x4xf32> to vector<1x16x4xf32>
    %c16_i32_5 = arith.constant 16 : i32
    %10 = arith.addi %1, %c16_i32_5 : i32
    %c15_i32 = arith.constant 15 : i32
    %11 = arith.minsi %10, %c15_i32 : i32
    %c0_6 = arith.constant 0 : index
    %12 = arith.index_cast %11 : i32 to index
    %c0_7 = arith.constant 0 : index
    %c0_8 = arith.constant 0 : index
    %13 = vector.load %arg2[%c0_6, %12, %c0_7, %c0_8] : memref<1x16x16x4xf32, #tpu.memory_space<vmem>>, vector<1x1x16x4xf32>
    %14 = vector.shape_cast %13 : vector<1x1x16x4xf32> to vector<1x16x4xf32>
    %15 = vector.extract_strided_slice %4 {offsets = [0, 0, 0], sizes = [15, 16, 4], strides = [1, 1, 1]} : vector<16x16x4xf32> to vector<15x16x4xf32>
    %16 = tpu.concatenate %9, %15 in 0 : vector<1x16x4xf32>, vector<15x16x4xf32> -> vector<16x16x4xf32>
    %17 = vector.extract_strided_slice %4 {offsets = [1, 0, 0], sizes = [15, 16, 4], strides = [1, 1, 1]} : vector<16x16x4xf32> to vector<15x16x4xf32>
    %18 = tpu.concatenate %17, %14 in 0 : vector<15x16x4xf32>, vector<1x16x4xf32> -> vector<16x16x4xf32>
    %19 = vector.extract_strided_slice %16 {offsets = [0, 0, 0], sizes = [16, 1, 4], strides = [1, 1, 1]} : vector<16x16x4xf32> to vector<16x1x4xf32>
    %20 = vector.extract_strided_slice %16 {offsets = [0, 0, 0], sizes = [16, 15, 4], strides = [1, 1, 1]} : vector<16x16x4xf32> to vector<16x15x4xf32>
    %21 = tpu.concatenate %19, %20 in 1 : vector<16x1x4xf32>, vector<16x15x4xf32> -> vector<16x16x4xf32>
    %22 = vector.extract_strided_slice %16 {offsets = [0, 1, 0], sizes = [16, 15, 4], strides = [1, 1, 1]} : vector<16x16x4xf32> to vector<16x15x4xf32>
    %23 = vector.extract_strided_slice %16 {offsets = [0, 15, 0], sizes = [16, 1, 4], strides = [1, 1, 1]} : vector<16x16x4xf32> to vector<16x1x4xf32>
    %24 = tpu.concatenate %22, %23 in 1 : vector<16x15x4xf32>, vector<16x1x4xf32> -> vector<16x16x4xf32>
    %25 = vector.extract_strided_slice %4 {offsets = [0, 0, 0], sizes = [16, 1, 4], strides = [1, 1, 1]} : vector<16x16x4xf32> to vector<16x1x4xf32>
    %26 = vector.extract_strided_slice %4 {offsets = [0, 0, 0], sizes = [16, 15, 4], strides = [1, 1, 1]} : vector<16x16x4xf32> to vector<16x15x4xf32>
    %27 = tpu.concatenate %25, %26 in 1 : vector<16x1x4xf32>, vector<16x15x4xf32> -> vector<16x16x4xf32>
    %28 = vector.extract_strided_slice %4 {offsets = [0, 1, 0], sizes = [16, 15, 4], strides = [1, 1, 1]} : vector<16x16x4xf32> to vector<16x15x4xf32>
    %29 = vector.extract_strided_slice %4 {offsets = [0, 15, 0], sizes = [16, 1, 4], strides = [1, 1, 1]} : vector<16x16x4xf32> to vector<16x1x4xf32>
    %30 = tpu.concatenate %28, %29 in 1 : vector<16x15x4xf32>, vector<16x1x4xf32> -> vector<16x16x4xf32>
    %31 = vector.extract_strided_slice %18 {offsets = [0, 0, 0], sizes = [16, 1, 4], strides = [1, 1, 1]} : vector<16x16x4xf32> to vector<16x1x4xf32>
    %32 = vector.extract_strided_slice %18 {offsets = [0, 0, 0], sizes = [16, 15, 4], strides = [1, 1, 1]} : vector<16x16x4xf32> to vector<16x15x4xf32>
    %33 = tpu.concatenate %31, %32 in 1 : vector<16x1x4xf32>, vector<16x15x4xf32> -> vector<16x16x4xf32>
    %34 = vector.extract_strided_slice %18 {offsets = [0, 1, 0], sizes = [16, 15, 4], strides = [1, 1, 1]} : vector<16x16x4xf32> to vector<16x15x4xf32>
    %35 = vector.extract_strided_slice %18 {offsets = [0, 15, 0], sizes = [16, 1, 4], strides = [1, 1, 1]} : vector<16x16x4xf32> to vector<16x1x4xf32>
    %36 = tpu.concatenate %34, %35 in 1 : vector<16x15x4xf32>, vector<16x1x4xf32> -> vector<16x16x4xf32>
    %37 = tpu.concatenate %21, %16, %24, %27, %4, %30, %33, %18, %36 in 2 : vector<16x16x4xf32>, vector<16x16x4xf32>, vector<16x16x4xf32>, vector<16x16x4xf32>, vector<16x16x4xf32>, vector<16x16x4xf32>, vector<16x16x4xf32>, vector<16x16x4xf32>, vector<16x16x4xf32> -> vector<16x16x36xf32>
    %c0_9 = arith.constant 0 : index
    %c0_10 = arith.constant 0 : index
    %c0_11 = arith.constant 0 : index
    %c0_12 = arith.constant 0 : index
    %38 = vector.load %arg3[%c0_9, %c0_10, %c0_11, %c0_12] : memref<1x16x16x36xf32, #tpu.memory_space<vmem>>, vector<1x16x16x36xf32>
    %39 = vector.shape_cast %38 : vector<1x16x16x36xf32> to vector<16x16x36xf32>
    %40 = vector.shape_cast %37 : vector<16x16x36xf32> to vector<1x16x16x36xf32>
    tpu.vector_store %arg3[%c0_9, %c0_10, %c0_11, %c0_12], %40 {strides = array<i32>} : memref<1x16x16x36xf32, #tpu.memory_space<vmem>>, vector<1x16x16x36xf32>,
    return
  }
  func.func @transform_0(%arg0: i32, %arg1: i32) -> (i32, i32, i32, i32) {
    %c0_i32 = arith.constant 0 : i32
    %c0_i32_0 = arith.constant 0 : i32
    %c0_i32_1 = arith.constant 0 : i32
    %c0_i32_2 = arith.constant 0 : i32
    return %arg0, %c0_i32, %c0_i32_0, %c0_i32_1 : i32, i32, i32, i32
  }
  func.func @transform_1(%arg0: i32, %arg1: i32) -> (i32, i32, i32, i32) {
    %c0_i32 = arith.constant 0 : i32
    %c0_i32_0 = arith.constant 0 : i32
    %c0_i32_1 = arith.constant 0 : i32
    return %arg0, %arg1, %c0_i32, %c0_i32_0 : i32, i32, i32, i32
  }
}

</mosaic_0001>

<bundles_post_ra>
// kernel: tpu_custom_call.1
= control target key start
LH: loop header
LB: loop body
LE: loop exit
PB: predicated region body
PF: predicated region fallthrough
CT: control target
= control target key end

     0   :  { %6 = vsyncpa [#allocation3], 0  ;;  %s3804_s0 = inlined_call_operand.vmem [shape: f32[2,16,16,4], index: 0, kind: input, shape index: {}]   ;;  %s3805_s1 = inlined_call_operand.hbm [shape: f32[2,16,16,36], index: 1, kind: output, shape index: {}]  }
   0x1   :  { %8 = vsyncpa [#allocation3 + $0x1], 0  ;;  %s1819_s6 = smov 0   ;;  %s1821_s7 = smov 0  }
   0x2   :  { %s1823_s8 = smov 0   ;;  %s1825_s9 = smov 0  }
   0x3   :  { %s1827_s10 = smov 0   ;;  %s1829_s11 = smov 0  }
   0x4 LB: > { %s1611_s12 = sadd.s32 4294967295, %s1798_s11   ;;  %s1612_s13 = sadd.s32 4294967294, %s1798_s11   ;;  %s1798_s11 = sphi %s1829_s11, %s14_s11   ;;  %s1794_s10 = sphi %s1827_s10, %s4238_s10   ;;  %s1790_s9 = sphi %s1825_s9, %s4237_s9   ;;  %s1786_s8 = sphi %s1823_s8, %s4236_s8   ;;  %s1782_s7 = sphi %s1821_s7, %s4235_s7   ;;  %s1778_s6 = sphi %s1819_s6, %s4234_s6  }
   0x5   : > { %s26_s14 = sadd.s32 1, %s1794_s10  ;;  %s61_s15 = sadd.s32 1, %s1786_s8 }
   0x6   : > { %p28_p0 = scmp.ge.s32.totalorder %s26_s14, 2  ;;  %p71_p1 = scmp.ne.s32.totalorder %s1786_s8, %s1782_s7 }
   0x7   : > { %p72_p2 = scmp.eq.s32.totalorder %s1611_s12, 1  ;;  %p77_p3 = scmp.ne.s32.totalorder %s1782_s7, %s1778_s6 }
   0x8   : > { %s4240_s14 = smov (%p28_p0, %s26_s14), 0  ;;  %p78_p5 = scmp.eq.s32.totalorder %s1612_s13, 1 }
   0x9   : > { %p1859_p4 = por %p72_p2, %p71_p1  ;;  %s56_s17 = ssub.s32 %s1794_s10, %s4240_s14 }
   0xa   : > { %p1615_p6 = scmp.ge.s32.totalorder %s1798_s11, 1  ;;  %p59_p7 = scmp.eq.s32.totalorder %s56_s17, 0 }
   0xb   : > { %p1866_p8 = por %p78_p5, %p77_p3  ;;  %p104_p9 = scmp.lt.s32.totalorder %s1798_s11, 3 }
   0xc   : > { %s1872_s19 = scalar_select %p59_p7, %s1786_s8, %s61_s15  }
   0xd   : > { %p105_p10 = pnand %p1615_p6, %p104_p9 }
   0xf   : > { %108 = sbr.rel (%p105_p10) target bundleno = 827 (0x33b), region = 24 }
  0x14   : > { %p124_p11 = scmp.lt.s32.totalorder %s1790_s9, 1  ;;  %s1800_s25 = smov 4   ;;  %vm308_vm0 = vcmask 1046528   ;;  %vm211_vm1 = vcmask 1040384   ;;  %vm1216_vm2 = vcmask 31744   ;;  %vm1249_vm3 = vcmask 64512  }
  0x15   : > { %s1801_s26 = smov 8   ;;  %s1802_s27 = smov 12   ;;  %vm1282_vm4 = vcmask 97280   ;;  %vm1348_vm5 = vcmask 162816   ;;  %vm1315_vm6 = vcmask 130048   ;;  %vm1381_vm7 = vcmask 195584  }
  0x16   : > { %s125_s20 = scalar_select %p124_p11, %s1790_s9, 1  ;;  %vm1414_vm8 = vcmask 228352   ;;  %vm1447_vm9 = vcmask 261120   ;;  %vm1480_vm10 = vcmask 293888  }
  0x17   : > { %s1803_s28 = smov 16   ;;  %s1804_s29 = smov 20  }
  0x18   : > { %s1626_s21 = sshll.u32 %s125_s20, 8  ;;  %s1805_s30 = smov 24  }
  0x19   : > { %s1879_s24 = scalar_lea.vmem %s3804_s0, %s1626_s21  ;;  %s1806_s2 = smov 28  }
  0x1a   : > { %v1882_v0 = vld [vmem:[%s1879_s24] sm:$0xff]  ;;  %v1885_v1 = vld [vmem:[%s1879_s24 + $0x10] sm:$0xff]  ;;  %v1894_v2 = vld [vmem:[%s1879_s24 + $0x8] sm:$0xff]  ;;  %s1807_s3 = smov 32   ;;  %s121_s4 = sand.u32 1, %s1782_s7  }
  0x1b   : > { %413 = vrot.lane.b32.xlu0 %v1882_v0, %s1800_s25  ;;  %421 = vrot.lane.b32.xlu2 %v1885_v1, %s1800_s25  ;;  %v1897_v3 = vld [vmem:[%s1879_s24 + $0x18] sm:$0xff]  ;;  %v1906_v4 = vld [vmem:[%s1879_s24 + $0x20] sm:$0xff]  ;;  %v309_v28 = vrot.slane %v1882_v0, 1  ;;  %v310_v29 = vrot.slane %v1894_v2, 1  ;;  %v315_v34 = vrot.slane %v1885_v1, 1  ;;  %s1616_s5 = sshll.u32 %s121_s4, 8 }
  0x1c   : > { %417 = vrot.lane.b32.xlu1 %v1882_v0, %s1800_s25  ;;  %v1909_v5 = vld [vmem:[%s1879_s24 + $0x30] sm:$0xff]  ;;  %v1912_v6 = vld [vmem:[%s1879_s24 + $0x28] sm:$0xff]  ;;  %v1921_v7 = vld [vmem:[%s1879_s24 + $0x38] sm:$0xff]  ;;  %v316_v35 = vrot.slane %v1897_v3, 1  ;;  %v318_v36 = vrot.slane %v1906_v4, 1  ;;  %s3608_s12 = scalar_lea.vmem [#allocation2], %s1616_s5 }
  0x1d   : > { %v1924_v8 = vld [vmem:[%s1879_s24 + $0x48] sm:$0xff]  ;;  %v1927_v9 = vld [vmem:[%s1879_s24 + $0x40] sm:$0xff]  ;;  %v1936_v10 = vld [vmem:[%s1879_s24 + $0x50] sm:$0xff]  ;;  %v2031_v31 = vsel %vm308_vm0, %v309_v28, %v310_v29  ;;  %v2044_v33 = vsel %vm308_vm0, %v310_v29, %v1894_v2  ;;  %v319_v37 = vrot.slane %v1912_v6, 1  ;;  %v322_v42 = vrot.slane %v1921_v7, 1  ;;  %s1627_s13 = sshll.u32 %s1790_s9, 8 }
  0x1e   : > { %v1939_v11 = vld [vmem:[%s1879_s24 + $0x60] sm:$0xff]  ;;  %v1942_v12 = vld [vmem:[%s1879_s24 + $0x58] sm:$0xff]  ;;  %v1951_v13 = vld [vmem:[%s1879_s24 + $0x68] sm:$0xff]  ;;  %v2059_v39 = vsel %vm308_vm0, %v315_v34, %v316_v35  ;;  %v2066_v41 = vsel %vm308_vm0, %v316_v35, %v1897_v3  ;;  %v321_v44 = vrot.slane %v1909_v5, 1  ;;  %v324_v48 = vrot.slane %v1927_v9, 1  ;;  %s1528_s20 = scalar_lea.hbm %s3805_s1, %s1627_s13  ;;  %s1529_s21 = sshll.u32 %s3608_s12, 4  ;;  %s1530_s21 = int_to_ptr.vmem [resolvable:$true] %s1529_s21 }
  0x1f   : > { %v1954_v14 = vld [vmem:[%s1879_s24 + $0x78] sm:$0xff]  ;;  %v1957_v15 = vld [vmem:[%s1879_s24 + $0x70] sm:$0xff]  ;;  %v1966_v16 = vld [vmem:[%s1879_s24 + $0x80] sm:$0xff]  ;;  %3911 = vst [vmem:[#allocation6_spill] sm:$0xff] %v2059_v39  ;;  %v2062_v40 = vsel %vm308_vm0, %v318_v36, %v319_v37  ;;  %v2080_v45 = vsel %vm308_vm0, %v319_v37, %v1912_v6  ;;  %v2084_v46 = vsel %vm308_vm0, %v322_v42, %v1921_v7  ;;  %v325_v49 = vrot.slane %v1924_v8, 1  ;;  %s1531_s22 = sshll.u32 %s1528_s20, 4  ;;  %s1532_s22 = int_to_ptr.hbm [resolvable:$true] %s1531_s22 }
  0x20   : > { %v1969_v17 = vld [vmem:[%s1879_s24 + $0x90] sm:$0xff]  ;;  %v1972_v18 = vld [vmem:[%s1879_s24 + $0x88] sm:$0xff]  ;;  %v1981_v19 = vld [vmem:[%s1879_s24 + $0x98] sm:$0xff]  ;;  %3912 = vst [vmem:[#allocation7_spill] sm:$0xff] %v2062_v40  ;;  %v2087_v47 = vsel %vm308_vm0, %v321_v44, %v322_v42  ;;  %v327_v50 = vrot.slane %v1936_v10, 1  ;;  %v328_v51 = vrot.slane %v1942_v12, 1 }
  0x21   : > { %v1984_v20 = vld [vmem:[%s1879_s24 + $0xa8] sm:$0xff]  ;;  %v1987_v21 = vld [vmem:[%s1879_s24 + $0xa0] sm:$0xff]  ;;  %v1996_v22 = vld [vmem:[%s1879_s24 + $0xb0] sm:$0xff]  ;;  %3913 = vst [vmem:[#allocation8_spill] sm:$0xff] %v2066_v41  ;;  %v2102_v53 = vsel %vm308_vm0, %v324_v48, %v325_v49  ;;  %v2109_v55 = vsel %vm308_vm0, %v325_v49, %v1924_v8  ;;  %v331_v56 = vrot.slane %v1951_v13, 1  ;;  %v330_v59 = vrot.slane %v1939_v11, 1 }
  0x22   : > { %v1999_v23 = vld [vmem:[%s1879_s24 + $0xc0] sm:$0xff]  ;;  %v2002_v24 = vld [vmem:[%s1879_s24 + $0xb8] sm:$0xff]  ;;  %v2011_v25 = vld [vmem:[%s1879_s24 + $0xc8] sm:$0xff]  ;;  %3915 = vst [vmem:[#allocation10_spill] sm:$0xff] %v2080_v45  ;;  %v2105_v54 = vsel %vm308_vm0, %v327_v50, %v328_v51  ;;  %v2127_v61 = vsel %vm308_vm0, %v328_v51, %v1942_v12  ;;  %v333_v28 = vrot.slane %v1957_v15, 1  ;;  %v334_v29 = vrot.slane %v1954_v14, 1 }
  0x23   : > { %415 = vrot.lane.b32.xlu0 %v1894_v2, %s1800_s25  ;;  %423 = vrot.lane.b32.xlu2 %v1897_v3, %s1800_s25  ;;  %v2014_v26 = vld [vmem:[%s1879_s24 + $0xd8] sm:$0xff]  ;;  %v2017_v27 = vld [vmem:[%s1879_s24 + $0xd0] sm:$0xff]  ;;  %3916 = vst [vmem:[#allocation11_spill] sm:$0xff] %v2084_v46  ;;  %v2131_v62 = vsel %vm308_vm0, %v331_v56, %v1951_v13  ;;  %v2134_v63 = vsel %vm308_vm0, %v330_v59, %v331_v56  ;;  %v336_v34 = vrot.slane %v1966_v16, 1  ;;  %v337_v35 = vrot.slane %v1972_v18, 1  ;;  %s1514_s9 = scalar_lea.sflag [#allocation3], %s121_s4 }
  0x24   : > { %419 = vrot.lane.b32.xlu1 %v1894_v2, %s1800_s25  ;;  %v2028_v30 = vld [vmem:[%s1879_s24 + $0xe0] sm:$0xff]  ;;  %v2034_v32 = vld [vmem:[%s1879_s24 + $0xe8] sm:$0xff]  ;;  %3917 = vst [vmem:[#allocation12_spill] sm:$0xff] %v2087_v47  ;;  %v2153_v44 = vsel %vm308_vm0, %v333_v28, %v334_v29  ;;  %v2160_v49 = vsel %vm308_vm0, %v334_v29, %v1954_v14  ;;  %v340_v50 = vrot.slane %v1981_v19, 1  ;;  %v339_v59 = vrot.slane %v1969_v17, 1  ;;  %s1734_s23 = sshra.s32 %s1532_s22, 4  ;;  %s1735_s23 = int_to_ptr.hbm [resolvable:$true] %s1734_s23 }
  0x25   : > { %3919 = vst [vmem:[#allocation14_spill] sm:$0xff] %v2102_v53  ;;  %v2156_v48 = vsel %vm308_vm0, %v336_v34, %v337_v35  ;;  %v2178_v29 = vsel %vm308_vm0, %v337_v35, %v1972_v18  ;;  %v343_v35 = vrot.slane %v1984_v20, 1  ;;  %p1741_p1 = scmp.lt.s32.totalorder %s1735_s23, %s3805_s1 }
  0x26   : > { %3920 = vst [vmem:[#allocation15_spill] sm:$0xff] %v2105_v54  ;;  %v2182_v34 = vsel %vm308_vm0, %v340_v50, %v1981_v19 }
  0x27   : > { %3921 = vst [vmem:[#allocation16_spill] sm:$0xff] %v2109_v55 }
  0x28   : > { %3925 = vst [vmem:[#allocation20_spill] sm:$0xff] %v2127_v61 }
  0x29   : > { %3926 = vst [vmem:[#allocation21_spill] sm:$0xff] %v2131_v62 }
  0x2a   : > { %3927 = vst [vmem:[#allocation22_spill] sm:$0xff] %v2134_v63 }
  0x2b   : > { %425 = vrot.lane.b32.xlu0 %v1906_v4, %s1800_s25  ;;  %429 = vrot.lane.b32.xlu2 %v1909_v5, %s1800_s25  ;;  %3931 = vst [vmem:[#allocation26_spill] sm:$0xff] %v2153_v44 }
  0x2c   : > { %427 = vrot.lane.b32.xlu1 %v1912_v6, %s1800_s25  ;;  %3932 = vst [vmem:[#allocation27_spill] sm:$0xff] %v2156_v48 }
  0x2d   : > { %3933 = vst [vmem:[#allocation28_spill] sm:$0xff] %v2160_v49 }
  0x2e   : > { %3937 = vst [vmem:[#allocation32_spill] sm:$0xff] %v2178_v29 }
  0x2f   : > { %3938 = vst [vmem:[#allocation33_spill] sm:$0xff] %v2182_v34 }
  0x33   : > { %431 = vrot.lane.b32.xlu0 %v1921_v7, %s1800_s25  ;;  %435 = vrot.lane.b32.xlu2 %v1924_v8, %s1800_s25 }
  0x34   : > { %433 = vrot.lane.b32.xlu1 %v1927_v9, %s1800_s25 }
  0x3b   : > { %437 = vrot.lane.b32.xlu0 %v1936_v10, %s1800_s25  ;;  %441 = vrot.lane.b32.xlu2 %v1939_v11, %s1800_s25 }
  0x3c   : > { %439 = vrot.lane.b32.xlu1 %v1942_v12, %s1800_s25 }
  0x43   : > { %443 = vrot.lane.b32.xlu0 %v1951_v13, %s1800_s25  ;;  %447 = vrot.lane.b32.xlu2 %v1954_v14, %s1800_s25 }
  0x44   : > { %445 = vrot.lane.b32.xlu1 %v1957_v15, %s1800_s25 }
  0x4b   : > { %449 = vrot.lane.b32.xlu0 %v1966_v16, %s1800_s25  ;;  %453 = vrot.lane.b32.xlu2 %v1969_v17, %s1800_s25 }
  0x4c   : > { %451 = vrot.lane.b32.xlu1 %v1972_v18, %s1800_s25 }
  0x53   : > { %455 = vrot.lane.b32.xlu0 %v1981_v19, %s1800_s25  ;;  %459 = vrot.lane.b32.xlu2 %v1984_v20, %s1800_s25 }
  0x54   : > { %457 = vrot.lane.b32.xlu1 %v1987_v21, %s1800_s25 }
  0x5b   : > { %461 = vrot.lane.b32.xlu0 %v1996_v22, %s1800_s25  ;;  %465 = vrot.lane.b32.xlu2 %v1999_v23, %s1800_s25 }
  0x5c   : > { %463 = vrot.lane.b32.xlu1 %v2002_v24, %s1800_s25 }
  0x63   : > { %467 = vrot.lane.b32.xlu0 %v2011_v25, %s1800_s25  ;;  %471 = vrot.lane.b32.xlu2 %v2014_v26, %s1800_s25 }
  0x64   : > { %469 = vrot.lane.b32.xlu1 %v2017_v27, %s1800_s25 }
  0x6b   : > { %473 = vrot.lane.b32.xlu0 %v2028_v30, %s1800_s25  ;;  %525 = vrot.lane.b32.xlu2 %v2031_v31, %s1801_s26 }
  0x6c   : > { %475 = vrot.lane.b32.xlu1 %v2034_v32, %s1800_s25 }
  0x73   : > { %527 = vrot.lane.b32.xlu0 %v2044_v33, %s1801_s26  ;;  %531 = vrot.lane.b32.xlu2 %v2044_v33, %s1801_s26 }
  0x74   : > { %529 = vrot.lane.b32.xlu1 %v2031_v31, %s1801_s26 }
  0x75   : > { %v2056_v38 = vpop.permute.xlu2 %421 }
  0x76   : > { %3910 = vst [vmem:[#allocation5_spill] sm:$0xff] %v2056_v38 }
  0x7b   : > { %533 = vrot.lane.b32.xlu0 %v2059_v39, %s1801_s26  ;;  %537 = vrot.lane.b32.xlu2 %v2062_v40, %s1801_s26 }
  0x7c   : > { %535 = vrot.lane.b32.xlu1 %v2066_v41, %s1801_s26 }
  0x7d   : > { %v2075_v43 = vpop.permute.xlu2 %423 }
  0x7e   : > { %3914 = vst [vmem:[#allocation9_spill] sm:$0xff] %v2075_v43  ;;  %v346_v43 = vrot.slane %v2002_v24, 1 }
  0x83   : > { %539 = vrot.lane.b32.xlu0 %v2080_v45, %s1801_s26  ;;  %543 = vrot.lane.b32.xlu2 %v2084_v46, %s1801_s26 }
  0x84   : > { %541 = vrot.lane.b32.xlu1 %v2087_v47, %s1801_s26 }
  0x85   : > { %v2099_v52 = vpop.permute.xlu2 %429 }
  0x86   : > { %3918 = vst [vmem:[#allocation13_spill] sm:$0xff] %v2099_v52  ;;  %v342_v52 = vrot.slane %v1987_v21, 1 }
  0x88   : > { %v2204_v38 = vsel %vm308_vm0, %v342_v52, %v343_v35 }
  0x89   : > { %3943 = vst [vmem:[#allocation38_spill] sm:$0xff] %v2204_v38 }
  0x8b   : > { %545 = vrot.lane.b32.xlu0 %v2102_v53, %s1801_s26  ;;  %549 = vrot.lane.b32.xlu2 %v2105_v54, %s1801_s26 }
  0x8c   : > { %547 = vrot.lane.b32.xlu1 %v2109_v55, %s1801_s26 }
  0x8d   : > { %v2118_v57 = vpop.permute.xlu0 %413  ;;  %v2120_v58 = vpop.permute.xlu2 %435 }
  0x8e   : > { %3922 = vst [vmem:[#allocation17_spill] sm:$0xff] %v2118_v57  ;;  %v2123_v60 = vpop.permute.xlu1 %417 }
  0x8f   : > { %3923 = vst [vmem:[#allocation18_spill] sm:$0xff] %v2120_v58  ;;  %v2185_v58 = vsel %vm308_vm0, %v339_v59, %v340_v50 }
  0x90   : > { %3924 = vst [vmem:[#allocation19_spill] sm:$0xff] %v2123_v60 }
  0x91   : > { %3939 = vst [vmem:[#allocation34_spill] sm:$0xff] %v2185_v58 }
  0x93   : > { %551 = vrot.lane.b32.xlu0 %v2127_v61, %s1801_s26  ;;  %555 = vrot.lane.b32.xlu2 %v2131_v62, %s1801_s26 }
  0x94   : > { %553 = vrot.lane.b32.xlu1 %v2134_v63, %s1801_s26 }
  0x95   : > { %v2146_v36 = vpop.permute.xlu0 %415  ;;  %v2148_v37 = vpop.permute.xlu2 %441 }
  0x96   : > { %3928 = vst [vmem:[#allocation23_spill] sm:$0xff] %v2146_v36  ;;  %v2150_v42 = vpop.permute.xlu1 %419 }
  0x97   : > { %3929 = vst [vmem:[#allocation24_spill] sm:$0xff] %v2148_v37  ;;  %v2211_v37 = vsel %vm308_vm0, %v343_v35, %v1984_v20  ;;  %v2229_v35 = vsel %vm308_vm0, %v346_v43, %v2002_v24 }
  0x98   : > { %3930 = vst [vmem:[#allocation25_spill] sm:$0xff] %v2150_v42 }
  0x99   : > { %3945 = vst [vmem:[#allocation40_spill] sm:$0xff] %v2211_v37 }
  0x9a   : > { %3949 = vst [vmem:[#allocation44_spill] sm:$0xff] %v2229_v35 }
  0x9b   : > { %557 = vrot.lane.b32.xlu0 %v2153_v44, %s1801_s26  ;;  %561 = vrot.lane.b32.xlu2 %v2156_v48, %s1801_s26 }
  0x9c   : > { %559 = vrot.lane.b32.xlu1 %v2160_v49, %s1801_s26 }
  0x9d   : > { %v2169_v51 = vpop.permute.xlu0 %425  ;;  %v2171_v56 = vpop.permute.xlu2 %447 }
  0x9e   : > { %3934 = vst [vmem:[#allocation29_spill] sm:$0xff] %v2169_v51  ;;  %v2174_v28 = vpop.permute.xlu1 %427  ;;  %v345_v51 = vrot.slane %v1996_v22, 1 }
  0x9f   : > { %3935 = vst [vmem:[#allocation30_spill] sm:$0xff] %v2171_v56 }
  0xa0   : > { %3936 = vst [vmem:[#allocation31_spill] sm:$0xff] %v2174_v28  ;;  %v2207_v56 = vsel %vm308_vm0, %v345_v51, %v346_v43  ;;  %v348_v51 = vrot.slane %v1999_v23, 1  ;;  %v352_v43 = vrot.slane %v2014_v26, 1 }
  0xa1   : > { %3944 = vst [vmem:[#allocation39_spill] sm:$0xff] %v2207_v56 }
  0xa3   : > { %563 = vrot.lane.b32.xlu0 %v2178_v29, %s1801_s26  ;;  %567 = vrot.lane.b32.xlu2 %v2182_v34, %s1801_s26 }
  0xa4   : > { %565 = vrot.lane.b32.xlu1 %v2185_v58, %s1801_s26 }
  0xa5   : > { %v2197_v28 = vpop.permute.xlu0 %431  ;;  %v2199_v50 = vpop.permute.xlu2 %453 }
  0xa6   : > { %3940 = vst [vmem:[#allocation35_spill] sm:$0xff] %v2197_v28  ;;  %v2201_v59 = vpop.permute.xlu1 %433  ;;  %v349_v28 = vrot.slane %v2011_v25, 1 }
  0xa7   : > { %3941 = vst [vmem:[#allocation36_spill] sm:$0xff] %v2199_v50 }
  0xa8   : > { %3942 = vst [vmem:[#allocation37_spill] sm:$0xff] %v2201_v59  ;;  %v2233_v60 = vsel %vm308_vm0, %v349_v28, %v2011_v25  ;;  %v2236_v36 = vsel %vm308_vm0, %v348_v51, %v349_v28 }
  0xa9   : > { %3950 = vst [vmem:[#allocation45_spill] sm:$0xff] %v2233_v60 }
  0xaa   : > { %3951 = vst [vmem:[#allocation46_spill] sm:$0xff] %v2236_v36 }
  0xab   : > { %569 = vrot.lane.b32.xlu0 %v2204_v38, %s1801_s26  ;;  %573 = vrot.lane.b32.xlu2 %v2207_v56, %s1801_s26 }
  0xac   : > { %571 = vrot.lane.b32.xlu1 %v2211_v37, %s1801_s26 }
  0xad   : > { %v2220_v52 = vpop.permute.xlu0 %437  ;;  %v2222_v59 = vpop.permute.xlu2 %459 }
  0xae   : > { %3946 = vst [vmem:[#allocation41_spill] sm:$0xff] %v2220_v52  ;;  %v2225_v50 = vpop.permute.xlu1 %439  ;;  %v351_v52 = vrot.slane %v2017_v27, 1 }
  0xaf   : > { %3947 = vst [vmem:[#allocation42_spill] sm:$0xff] %v2222_v59  ;;  %v354_v59 = vrot.slane %v2028_v30, 1 }
  0xb0   : > { %3948 = vst [vmem:[#allocation43_spill] sm:$0xff] %v2225_v50  ;;  %v355_v50 = vrot.slane %v2034_v32, 1  ;;  %v2255_v57 = vsel %vm308_vm0, %v351_v52, %v352_v43 }
  0xb1   : > { %3955 = vst [vmem:[#allocation50_spill] sm:$0xff] %v2255_v57 }
  0xb3   : > { %575 = vrot.lane.b32.xlu0 %v2229_v35, %s1801_s26  ;;  %579 = vrot.lane.b32.xlu2 %v2233_v60, %s1801_s26  ;;  %v2258_v60 = vsel %vm308_vm0, %v354_v59, %v355_v50  ;;  %v2262_v35 = vsel %vm308_vm0, %v352_v43, %v2014_v26  ;;  %v213_v59 = vrot.slane %v1894_v2, 7  ;;  %v212_v43 = vrot.slane %v1882_v0, 7 }
  0xb4   : > { %577 = vrot.lane.b32.xlu1 %v2236_v36, %s1801_s26  ;;  %3956 = vst [vmem:[#allocation51_spill] sm:$0xff] %v2258_v60 }
  0xb5   : > { %v2248_v42 = vpop.permute.xlu0 %443  ;;  %v2250_v28 = vpop.permute.xlu2 %465  ;;  %3957 = vst [vmem:[#allocation52_spill] sm:$0xff] %v2262_v35 }
  0xb6   : > { %3952 = vst [vmem:[#allocation47_spill] sm:$0xff] %v2248_v42  ;;  %v2252_v51 = vpop.permute.xlu1 %445  ;;  %v2280_v42 = vsel %vm308_vm0, %v355_v50, %v2034_v32 }
  0xb7   : > { %3953 = vst [vmem:[#allocation48_spill] sm:$0xff] %v2250_v28 }
  0xb8   : > { %3954 = vst [vmem:[#allocation49_spill] sm:$0xff] %v2252_v51 }
  0xb9   : > { %3961 = vst [vmem:[#allocation56_spill] sm:$0xff] %v2280_v42 }
  0xbb   : > { %581 = vrot.lane.b32.xlu0 %v2255_v57, %s1801_s26  ;;  %585 = vrot.lane.b32.xlu2 %v2258_v60, %s1801_s26  ;;  %v2283_v60 = vsel %vm211_vm1, %v212_v43, %v213_v59  ;;  %v2287_v57 = vsel %vm211_vm1, %v1882_v0, %v212_v43  ;;  %v218_v59 = vrot.slane %v1885_v1, 7 }
  0xbc   : > { %583 = vrot.lane.b32.xlu1 %v2262_v35, %s1801_s26  ;;  %3962 = vst [vmem:[#allocation57_spill] sm:$0xff] %v2283_v60  ;;  %v222_v35 = vrot.slane %v1912_v6, 7 }
  0xbd   : > { %v2270_v28 = vpop.permute.xlu0 %449  ;;  %v2272_v52 = vpop.permute.xlu2 %471  ;;  %3963 = vst [vmem:[#allocation58_spill] sm:$0xff] %v2287_v57 }
  0xbe   : > { %3958 = vst [vmem:[#allocation53_spill] sm:$0xff] %v2270_v28  ;;  %v2275_v51 = vpop.permute.xlu1 %451  ;;  %v219_v28 = vrot.slane %v1897_v3, 7 }
  0xbf   : > { %3959 = vst [vmem:[#allocation54_spill] sm:$0xff] %v2272_v52 }
  0xc0   : > { %3960 = vst [vmem:[#allocation55_spill] sm:$0xff] %v2275_v51  ;;  %v221_v51 = vrot.slane %v1906_v4, 7 }
  0xc3   : > { %587 = vrot.lane.b32.xlu0 %v2280_v42, %s1801_s26  ;;  %639 = vrot.lane.b32.xlu2 %v2283_v60, %s1802_s27  ;;  %v2306_v42 = vsel %vm211_vm1, %v1885_v1, %v218_v59  ;;  %v2310_v60 = vsel %vm211_vm1, %v1906_v4, %v221_v51 }
  0xc4   : > { %637 = vrot.lane.b32.xlu1 %v2287_v57, %s1802_s27  ;;  %3967 = vst [vmem:[#allocation62_spill] sm:$0xff] %v2306_v42  ;;  %v224_v57 = vrot.slane %v1909_v5, 7 }
  0xc5   : > { %v2295_v52 = vpop.permute.xlu0 %455  ;;  %v2297_v50 = vpop.permute.xlu2 %525  ;;  %3968 = vst [vmem:[#allocation63_spill] sm:$0xff] %v2310_v60 }
  0xc6   : > { %3964 = vst [vmem:[#allocation59_spill] sm:$0xff] %v2295_v52  ;;  %v2301_v43 = vpop.permute.xlu1 %457  ;;  %v2313_v52 = vsel %vm211_vm1, %v218_v59, %v219_v28  ;;  %v225_v28 = vrot.slane %v1921_v7, 7 }
  0xc7   : > { %3965 = vst [vmem:[#allocation60_spill] sm:$0xff] %v2297_v50 }
  0xc8   : > { %3966 = vst [vmem:[#allocation61_spill] sm:$0xff] %v2301_v43 }
  0xc9   : > { %3969 = vst [vmem:[#allocation64_spill] sm:$0xff] %v2313_v52 }
  0xcb   : > { %641 = vrot.lane.b32.xlu0 %v2306_v42, %s1802_s27  ;;  %645 = vrot.lane.b32.xlu2 %v2310_v60, %s1802_s27  ;;  %v2331_v42 = vsel %vm211_vm1, %v221_v51, %v222_v35  ;;  %v2334_v60 = vsel %vm211_vm1, %v224_v57, %v225_v28  ;;  %v227_v51 = vrot.slane %v1927_v9, 7  ;;  %v230_v28 = vrot.slane %v1936_v10, 7 }
  0xcc   : > { %643 = vrot.lane.b32.xlu1 %v2313_v52, %s1802_s27  ;;  %3973 = vst [vmem:[#allocation68_spill] sm:$0xff] %v2331_v42  ;;  %v2338_v52 = vsel %vm211_vm1, %v1909_v5, %v224_v57  ;;  %v228_v57 = vrot.slane %v1924_v8, 7 }
  0xcd   : > { %v2321_v43 = vpop.permute.xlu0 %461  ;;  %v2323_v50 = vpop.permute.xlu2 %531  ;;  %3974 = vst [vmem:[#allocation69_spill] sm:$0xff] %v2334_v60 }
  0xce   : > { %3970 = vst [vmem:[#allocation65_spill] sm:$0xff] %v2321_v43  ;;  %v2328_v59 = vpop.permute.xlu1 %463 }
  0xcf   : > { %3971 = vst [vmem:[#allocation66_spill] sm:$0xff] %v2323_v50  ;;  %v231_v50 = vrot.slane %v1942_v12, 7 }
  0xd0   : > { %3972 = vst [vmem:[#allocation67_spill] sm:$0xff] %v2328_v59 }
  0xd1   : > { %3975 = vst [vmem:[#allocation70_spill] sm:$0xff] %v2338_v52 }
  0xd3   : > { %647 = vrot.lane.b32.xlu0 %v2331_v42, %s1802_s27  ;;  %651 = vrot.lane.b32.xlu2 %v2334_v60, %s1802_s27  ;;  %v2357_v42 = vsel %vm211_vm1, %v1927_v9, %v227_v51  ;;  %v2361_v60 = vsel %vm211_vm1, %v1936_v10, %v230_v28 }
  0xd4   : > { %649 = vrot.lane.b32.xlu1 %v2338_v52, %s1802_s27  ;;  %3979 = vst [vmem:[#allocation74_spill] sm:$0xff] %v2357_v42  ;;  %v233_v52 = vrot.slane %v1939_v11, 7 }
  0xd5   : > { %v2346_v59 = vpop.permute.xlu0 %467  ;;  %v2348_v35 = vpop.permute.xlu2 %537  ;;  %3980 = vst [vmem:[#allocation75_spill] sm:$0xff] %v2361_v60 }
  0xd6   : > { %3976 = vst [vmem:[#allocation71_spill] sm:$0xff] %v2346_v59  ;;  %v2352_v43 = vpop.permute.xlu1 %469  ;;  %v2364_v59 = vsel %vm211_vm1, %v227_v51, %v228_v57  ;;  %v234_v51 = vrot.slane %v1951_v13, 7 }
  0xd7   : > { %3977 = vst [vmem:[#allocation72_spill] sm:$0xff] %v2348_v35 }
  0xd8   : > { %3978 = vst [vmem:[#allocation73_spill] sm:$0xff] %v2352_v43 }
  0xd9   : > { %3981 = vst [vmem:[#allocation76_spill] sm:$0xff] %v2364_v59 }
  0xdb   : > { %653 = vrot.lane.b32.xlu0 %v2357_v42, %s1802_s27  ;;  %657 = vrot.lane.b32.xlu2 %v2361_v60, %s1802_s27  ;;  %v2382_v42 = vsel %vm211_vm1, %v230_v28, %v231_v50  ;;  %v2385_v60 = vsel %vm211_vm1, %v233_v52, %v234_v51  ;;  %v236_v28 = vrot.slane %v1957_v15, 7  ;;  %v239_v51 = vrot.slane %v1966_v16, 7 }
  0xdc   : > { %655 = vrot.lane.b32.xlu1 %v2364_v59, %s1802_s27  ;;  %3985 = vst [vmem:[#allocation80_spill] sm:$0xff] %v2382_v42  ;;  %v2389_v59 = vsel %vm211_vm1, %v1939_v11, %v233_v52  ;;  %v237_v52 = vrot.slane %v1954_v14, 7 }
  0xdd   : > { %v2372_v35 = vpop.permute.xlu0 %473  ;;  %v2374_v43 = vpop.permute.xlu2 %543  ;;  %3986 = vst [vmem:[#allocation81_spill] sm:$0xff] %v2385_v60 }
  0xde   : > { %3982 = vst [vmem:[#allocation77_spill] sm:$0xff] %v2372_v35  ;;  %v2379_v57 = vpop.permute.xlu1 %475  ;;  %v2408_v35 = vsel %vm211_vm1, %v1957_v15, %v236_v28 }
  0xdf   : > { %3983 = vst [vmem:[#allocation78_spill] sm:$0xff] %v2374_v43 }
  0xe0   : > { %3984 = vst [vmem:[#allocation79_spill] sm:$0xff] %v2379_v57 }
  0xe1   : > { %3987 = vst [vmem:[#allocation82_spill] sm:$0xff] %v2389_v59 }
  0xe2   : > { %3991 = vst [vmem:[#allocation86_spill] sm:$0xff] %v2408_v35 }
  0xe3   : > { %659 = vrot.lane.b32.xlu0 %v2382_v42, %s1802_s27  ;;  %663 = vrot.lane.b32.xlu2 %v2385_v60, %s1802_s27  ;;  %v2412_v60 = vsel %vm211_vm1, %v1966_v16, %v239_v51  ;;  %v242_v42 = vrot.slane %v1969_v17, 7 }
  0xe4   : > { %661 = vrot.lane.b32.xlu1 %v2389_v59, %s1802_s27  ;;  %3992 = vst [vmem:[#allocation87_spill] sm:$0xff] %v2412_v60  ;;  %v240_v59 = vrot.slane %v1972_v18, 7 }
  0xe5   : > { %v2397_v43 = vpop.permute.xlu0 %527  ;;  %v2399_v50 = vpop.permute.xlu2 %549 }
  0xe6   : > { %3988 = vst [vmem:[#allocation83_spill] sm:$0xff] %v2397_v43  ;;  %v2403_v57 = vpop.permute.xlu1 %529  ;;  %v2415_v43 = vsel %vm211_vm1, %v236_v28, %v237_v52  ;;  %v243_v28 = vrot.slane %v1981_v19, 7 }
  0xe7   : > { %3989 = vst [vmem:[#allocation84_spill] sm:$0xff] %v2399_v50 }
  0xe8   : > { %3990 = vst [vmem:[#allocation85_spill] sm:$0xff] %v2403_v57 }
  0xe9   : > { %3993 = vst [vmem:[#allocation88_spill] sm:$0xff] %v2415_v43 }
  0xeb   : > { %665 = vrot.lane.b32.xlu0 %v2408_v35, %s1802_s27  ;;  %669 = vrot.lane.b32.xlu2 %v2412_v60, %s1802_s27  ;;  %v2433_v35 = vsel %vm211_vm1, %v239_v51, %v240_v59  ;;  %v2436_v60 = vsel %vm211_vm1, %v242_v42, %v243_v28  ;;  %v245_v51 = vrot.slane %v1987_v21, 7  ;;  %v248_v28 = vrot.slane %v1996_v22, 7 }
  0xec   : > { %667 = vrot.lane.b32.xlu1 %v2415_v43, %s1802_s27  ;;  %3997 = vst [vmem:[#allocation92_spill] sm:$0xff] %v2433_v35  ;;  %v2440_v43 = vsel %vm211_vm1, %v1969_v17, %v242_v42  ;;  %v246_v42 = vrot.slane %v1984_v20, 7 }
  0xed   : > { %v2423_v50 = vpop.permute.xlu0 %533  ;;  %v2425_v57 = vpop.permute.xlu2 %555  ;;  %3998 = vst [vmem:[#allocation93_spill] sm:$0xff] %v2436_v60 }
  0xee   : > { %3994 = vst [vmem:[#allocation89_spill] sm:$0xff] %v2423_v50  ;;  %v2430_v52 = vpop.permute.xlu1 %535 }
  0xef   : > { %3995 = vst [vmem:[#allocation90_spill] sm:$0xff] %v2425_v57  ;;  %v249_v57 = vrot.slane %v2002_v24, 7 }
  0xf0   : > { %3996 = vst [vmem:[#allocation91_spill] sm:$0xff] %v2430_v52 }
  0xf1   : > { %3999 = vst [vmem:[#allocation94_spill] sm:$0xff] %v2440_v43 }
  0xf3   : > { %671 = vrot.lane.b32.xlu0 %v2433_v35, %s1802_s27  ;;  %675 = vrot.lane.b32.xlu2 %v2436_v60, %s1802_s27  ;;  %v2459_v35 = vsel %vm211_vm1, %v1987_v21, %v245_v51  ;;  %v2463_v60 = vsel %vm211_vm1, %v1996_v22, %v248_v28 }
  0xf4   : > { %673 = vrot.lane.b32.xlu1 %v2440_v43, %s1802_s27  ;;  %4003 = vst [vmem:[#allocation98_spill] sm:$0xff] %v2459_v35  ;;  %v251_v43 = vrot.slane %v1999_v23, 7 }
  0xf5   : > { %v2448_v52 = vpop.permute.xlu0 %539  ;;  %v2450_v59 = vpop.permute.xlu2 %561  ;;  %4004 = vst [vmem:[#allocation99_spill] sm:$0xff] %v2463_v60 }
  0xf6   : > { %4000 = vst [vmem:[#allocation95_spill] sm:$0xff] %v2448_v52  ;;  %v2454_v50 = vpop.permute.xlu1 %541  ;;  %v2466_v52 = vsel %vm211_vm1, %v245_v51, %v246_v42  ;;  %v252_v51 = vrot.slane %v2011_v25, 7 }
  0xf7   : > { %4001 = vst [vmem:[#allocation96_spill] sm:$0xff] %v2450_v59 }
  0xf8   : > { %4002 = vst [vmem:[#allocation97_spill] sm:$0xff] %v2454_v50 }
  0xf9   : > { %4005 = vst [vmem:[#allocation100_spill] sm:$0xff] %v2466_v52 }
  0xfb   : > { %677 = vrot.lane.b32.xlu0 %v2459_v35, %s1802_s27  ;;  %681 = vrot.lane.b32.xlu2 %v2463_v60, %s1802_s27  ;;  %v2484_v35 = vsel %vm211_vm1, %v248_v28, %v249_v57  ;;  %v2487_v60 = vsel %vm211_vm1, %v251_v43, %v252_v51  ;;  %v254_v28 = vrot.slane %v2017_v27, 7  ;;  %v257_v51 = vrot.slane %v2028_v30, 7 }
  0xfc   : > { %679 = vrot.lane.b32.xlu1 %v2466_v52, %s1802_s27  ;;  %4009 = vst [vmem:[#allocation104_spill] sm:$0xff] %v2484_v35  ;;  %v2509_v52 = vld [vmem:[%s1879_s24 + $0xf0] sm:$0xff] }
  0xfd   : > { %v2474_v50 = vpop.permute.xlu0 %545  ;;  %v2476_v59 = vpop.permute.xlu2 %567  ;;  %4010 = vst [vmem:[#allocation105_spill] sm:$0xff] %v2487_v60 }
  0xfe   : > { %4006 = vst [vmem:[#allocation101_spill] sm:$0xff] %v2474_v50  ;;  %v2481_v42 = vpop.permute.xlu1 %547  ;;  %v2491_v50 = vsel %vm211_vm1, %v1999_v23, %v251_v43  ;;  %v255_v43 = vrot.slane %v2014_v26, 7 }
  0xff   : > { %4007 = vst [vmem:[#allocation102_spill] sm:$0xff] %v2476_v59 }
 0x100   : > { %4008 = vst [vmem:[#allocation103_spill] sm:$0xff] %v2481_v42 }
 0x101   : > { %4011 = vst [vmem:[#allocation106_spill] sm:$0xff] %v2491_v50 }
 0x102   : > { %4015 = vst [vmem:[#allocation110_spill] sm:$0xff] %v2509_v52 }
 0x103   : > { %683 = vrot.lane.b32.xlu0 %v2484_v35, %s1802_s27  ;;  %687 = vrot.lane.b32.xlu2 %v2487_v60, %s1802_s27  ;;  %v2512_v35 = vld [vmem:[%s1879_s24 + $0xf8] sm:$0xff]  ;;  %v2516_v60 = vsel %vm211_vm1, %v2017_v27, %v254_v28 }
 0x104   : > { %685 = vrot.lane.b32.xlu1 %v2491_v50, %s1802_s27  ;;  %4016 = vst [vmem:[#allocation111_spill] sm:$0xff] %v2512_v35  ;;  %v392_v50 = vrot.slane %v2512_v35, 7 }
 0x105   : > { %v2499_v42 = vpop.permute.xlu0 %551  ;;  %v2501_v57 = vpop.permute.xlu2 %573  ;;  %4017 = vst [vmem:[#allocation112_spill] sm:$0xff] %v2516_v60 }
 0x106   : > { %4012 = vst [vmem:[#allocation107_spill] sm:$0xff] %v2499_v42  ;;  %v2505_v59 = vpop.permute.xlu1 %553  ;;  %v2520_v42 = vsel %vm211_vm1, %v2028_v30, %v257_v51 }
 0x107   : > { %4013 = vst [vmem:[#allocation108_spill] sm:$0xff] %v2501_v57  ;;  %v2523_v57 = vsel %vm211_vm1, %v254_v28, %v255_v43  ;;  %v258_v28 = vrot.slane %v2034_v32, 7 }
 0x108   : > { %4014 = vst [vmem:[#allocation109_spill] sm:$0xff] %v2505_v59  ;;  %v391_v59 = vrot.slane %v2509_v52, 7 }
 0x109   : > { %4018 = vst [vmem:[#allocation113_spill] sm:$0xff] %v2520_v42 }
 0x10a   : > { %4019 = vst [vmem:[#allocation114_spill] sm:$0xff] %v2523_v57 }
 0x10b   : > { %689 = vrot.lane.b32.xlu0 %v2516_v60, %s1802_s27  ;;  %693 = vrot.lane.b32.xlu2 %v2520_v42, %s1802_s27  ;;  %v2541_v60 = vsel %vm211_vm1, %v391_v59, %v392_v50  ;;  %v2545_v42 = vsel %vm211_vm1, %v2509_v52, %v391_v59 }
 0x10c   : > { %691 = vrot.lane.b32.xlu1 %v2523_v57, %s1802_s27  ;;  %v2548_v57 = vsel %vm211_vm1, %v257_v51, %v258_v28 }
 0x10d   : > { %v2533_v36 = vpop.permute.xlu0 %557  ;;  %v2535_v56 = vpop.permute.xlu2 %579 }
 0x10e   : > { %4020 = vst [vmem:[#allocation115_spill] sm:$0xff] %v2535_v56  ;;  %v2538_v43 = vpop.permute.xlu1 %559 }
 0x10f   : > { %4021 = vst [vmem:[#allocation116_spill] sm:$0xff] %v2538_v43 }
 0x113   : > { %695 = vrot.lane.b32.xlu0 %v2548_v57, %s1802_s27  ;;  %699 = vrot.lane.b32.xlu2 %v2541_v60, %s1802_s27 }
 0x114   : > { %697 = vrot.lane.b32.xlu1 %v2545_v42, %s1802_s27 }
 0x115   : > { %v2556_v43 = vpop.permute.xlu0 %563  ;;  %v2558_v50 = vpop.permute.xlu2 %585 }
 0x116   : > { %v2560_v56 = vpop.permute.xlu1 %565 }
 0x11b   : > { %733 = vrot.lane.b32.xlu0 %v1882_v0, %s1803_s28  ;;  %737 = vrot.lane.b32.xlu2 %v1885_v1, %s1803_s28 }
 0x11c   : > { %735 = vrot.lane.b32.xlu1 %v1894_v2, %s1803_s28 }
 0x11d   : > { %v2568_v59 = vpop.permute.xlu0 %569  ;;  %v2570_v51 = vpop.permute.xlu2 %639 }
 0x11e   : > { %v2572_v28 = vpop.permute.xlu1 %571 }
 0x123   : > { %739 = vrot.lane.b32.xlu0 %v1897_v3, %s1803_s28  ;;  %743 = vrot.lane.b32.xlu2 %v1912_v6, %s1803_s28 }
 0x124   : > { %741 = vrot.lane.b32.xlu1 %v1906_v4, %s1803_s28 }
 0x125   : > { %v2580_v0 = vpop.permute.xlu0 %575  ;;  %v2582_v1 = vpop.permute.xlu2 %645 }
 0x126   : > { %v2584_v2 = vpop.permute.xlu1 %577 }
 0x12b   : > { %745 = vrot.lane.b32.xlu0 %v1909_v5, %s1803_s28  ;;  %749 = vrot.lane.b32.xlu2 %v1927_v9, %s1803_s28 }
 0x12c   : > { %747 = vrot.lane.b32.xlu1 %v1921_v7, %s1803_s28 }
 0x12d   : > { %v2592_v3 = vpop.permute.xlu0 %581  ;;  %v2594_v6 = vpop.permute.xlu2 %651 }
 0x12e   : > { %4022 = vst [vmem:[#allocation117_spill] sm:$0xff] %v2592_v3  ;;  %v2596_v4 = vpop.permute.xlu1 %583  ;;  %v4082_v3 = vld [vmem:[#allocation81_spill] sm:$0xff] }
 0x12f   : > { %4023 = vst [vmem:[#allocation118_spill] sm:$0xff] %v2594_v6 }
 0x130   : > { %4024 = vst [vmem:[#allocation119_spill] sm:$0xff] %v2596_v4  ;;  %v4081_v4 = vld [vmem:[#allocation83_spill] sm:$0xff] }
 0x133   : > { %751 = vrot.lane.b32.xlu0 %v1924_v8, %s1803_s28  ;;  %755 = vrot.lane.b32.xlu2 %v1942_v12, %s1803_s28 }
 0x134   : > { %753 = vrot.lane.b32.xlu1 %v1936_v10, %s1803_s28 }
 0x135   : > { %v2604_v5 = vpop.permute.xlu0 %587  ;;  %v2606_v9 = vpop.permute.xlu2 %657 }
 0x136   : > { %4025 = vst [vmem:[#allocation120_spill] sm:$0xff] %v2604_v5  ;;  %v2608_v7 = vpop.permute.xlu1 %637 }
 0x137   : > { %4026 = vst [vmem:[#allocation121_spill] sm:$0xff] %v2606_v9 }
 0x13b   : > { %757 = vrot.lane.b32.xlu0 %v1939_v11, %s1803_s28  ;;  %761 = vrot.lane.b32.xlu2 %v1957_v15, %s1803_s28 }
 0x13c   : > { %759 = vrot.lane.b32.xlu1 %v1951_v13, %s1803_s28 }
 0x13d   : > { %v2616_v8 = vpop.permute.xlu0 %641  ;;  %v2618_v12 = vpop.permute.xlu2 %663 }
 0x13e   : > { %v2620_v10 = vpop.permute.xlu1 %643 }
 0x143   : > { %763 = vrot.lane.b32.xlu0 %v1954_v14, %s1803_s28  ;;  %767 = vrot.lane.b32.xlu2 %v1972_v18, %s1803_s28 }
 0x144   : > { %765 = vrot.lane.b32.xlu1 %v1966_v16, %s1803_s28 }
 0x145   : > { %v2628_v11 = vpop.permute.xlu0 %647  ;;  %v2630_v15 = vpop.permute.xlu2 %669 }
 0x146   : > { %4027 = vst [vmem:[#allocation122_spill] sm:$0xff] %v2628_v11  ;;  %v2632_v13 = vpop.permute.xlu1 %649 }
 0x147   : > { %4028 = vst [vmem:[#allocation123_spill] sm:$0xff] %v2632_v13 }
 0x14b   : > { %769 = vrot.lane.b32.xlu0 %v1969_v17, %s1803_s28  ;;  %773 = vrot.lane.b32.xlu2 %v1987_v21, %s1803_s28 }
 0x14c   : > { %771 = vrot.lane.b32.xlu1 %v1981_v19, %s1803_s28 }
 0x14d   : > { %v2640_v14 = vpop.permute.xlu0 %653  ;;  %v2642_v18 = vpop.permute.xlu2 %675 }
 0x14e   : > { %4029 = vst [vmem:[#allocation124_spill] sm:$0xff] %v2640_v14  ;;  %v2644_v16 = vpop.permute.xlu1 %655  ;;  %v4048_v14 = vld [vmem:[#allocation52_spill] sm:$0xff] }
 0x14f   : > { %4030 = vst [vmem:[#allocation125_spill] sm:$0xff] %v2644_v16 }
 0x153   : > { %775 = vrot.lane.b32.xlu0 %v1984_v20, %s1803_s28  ;;  %779 = vrot.lane.b32.xlu2 %v2002_v24, %s1803_s28 }
 0x154   : > { %777 = vrot.lane.b32.xlu1 %v1996_v22, %s1803_s28 }
 0x155   : > { %v2652_v17 = vpop.permute.xlu0 %659  ;;  %v2654_v21 = vpop.permute.xlu2 %681 }
 0x156   : > { %4031 = vst [vmem:[#allocation126_spill] sm:$0xff] %v2652_v17  ;;  %v2656_v19 = vpop.permute.xlu1 %661 }
 0x157   : > { %4032 = vst [vmem:[#allocation127_spill] sm:$0xff] %v2656_v19 }
 0x15b   : > { %781 = vrot.lane.b32.xlu0 %v1999_v23, %s1803_s28  ;;  %785 = vrot.lane.b32.xlu2 %v2017_v27, %s1803_s28 }
 0x15c   : > { %783 = vrot.lane.b32.xlu1 %v2011_v25, %s1803_s28 }
 0x15d   : > { %v2664_v20 = vpop.permute.xlu0 %665  ;;  %v2666_v24 = vpop.permute.xlu2 %687 }
 0x15e   : > { %v2668_v22 = vpop.permute.xlu1 %667 }
 0x163   : > { %787 = vrot.lane.b32.xlu0 %v2014_v26, %s1803_s28  ;;  %791 = vrot.lane.b32.xlu2 %v2034_v32, %s1803_s28 }
 0x164   : > { %789 = vrot.lane.b32.xlu1 %v2028_v30, %s1803_s28 }
 0x165   : > { %v2676_v23 = vpop.permute.xlu0 %671  ;;  %v2678_v27 = vpop.permute.xlu2 %693 }
 0x166   : > { %4033 = vst [vmem:[#allocation128_spill] sm:$0xff] %v2678_v27  ;;  %v2680_v25 = vpop.permute.xlu1 %673  ;;  %v4067_v27 = vld [vmem:[#allocation68_spill] sm:$0xff] }
 0x16b   : > { %793 = vrot.lane.b32.xlu0 %v2509_v52, %s1803_s28  ;;  %830 = vrot.lane.b32.xlu2 %v2031_v31, %s1804_s29 }
 0x16c   : > { %795 = vrot.lane.b32.xlu1 %v2512_v35, %s1803_s28  ;;  %s1740_s28 = scalar_lea.hbm %s3805_s1, 512 }
 0x16d   : > { %v2688_v26 = vpop.permute.xlu0 %677  ;;  %v2690_v32 = vpop.permute.xlu2 %699 }
 0x16e   : > { %4034 = vst [vmem:[#allocation129_spill] sm:$0xff] %v2690_v32  ;;  %v2692_v30 = vpop.permute.xlu1 %679 }
 0x173   : > { %832 = vrot.lane.b32.xlu0 %v2044_v33, %s1804_s29  ;;  %836 = vrot.lane.b32.xlu2 %v2066_v41, %s1804_s29 }
 0x174   : > { %834 = vrot.lane.b32.xlu1 %v2059_v39, %s1804_s29 }
 0x175   : > { %v2700_v19 = vpop.permute.xlu0 %683  ;;  %v2702_v31 = vpop.permute.xlu2 %737 }
 0x176   : > { %v2704_v17 = vpop.permute.xlu1 %685 }
 0x17b   : > { %838 = vrot.lane.b32.xlu0 %v2062_v40, %s1804_s29  ;;  %842 = vrot.lane.b32.xlu2 %v2087_v47, %s1804_s29 }
 0x17c   : > { %840 = vrot.lane.b32.xlu1 %v2080_v45, %s1804_s29 }
 0x17d   : > { %v2712_v33 = vpop.permute.xlu0 %689  ;;  %v2714_v41 = vpop.permute.xlu2 %743 }
 0x17e   : > { %4035 = vst [vmem:[#allocation130_spill] sm:$0xff] %v2714_v41  ;;  %v2716_v39 = vpop.permute.xlu1 %691 }
 0x183   : > { %844 = vrot.lane.b32.xlu0 %v2084_v46, %s1804_s29  ;;  %848 = vrot.lane.b32.xlu2 %v2109_v55, %s1804_s29 }
 0x184   : > { %846 = vrot.lane.b32.xlu1 %v2102_v53, %s1804_s29 }
 0x185   : > { %v2724_v40 = vpop.permute.xlu0 %695  ;;  %v2726_v47 = vpop.permute.xlu2 %749 }
 0x186   : > { %4036 = vst [vmem:[#allocation131_spill] sm:$0xff] %v2724_v40  ;;  %v2728_v45 = vpop.permute.xlu1 %697 }
 0x187   : > { %4037 = vst [vmem:[#allocation132_spill] sm:$0xff] %v2726_v47 }
 0x18b   : > { %850 = vrot.lane.b32.xlu0 %v2105_v54, %s1804_s29  ;;  %854 = vrot.lane.b32.xlu2 %v2134_v63, %s1804_s29 }
 0x18c   : > { %852 = vrot.lane.b32.xlu1 %v2127_v61, %s1804_s29 }
 0x18d   : > { %v734_v46 = vpop.permute.xlu0 %733  ;;  %v2736_v55 = vpop.permute.xlu2 %755 }
 0x18e   : > { %4038 = vst [vmem:[#allocation133_spill] sm:$0xff] %v2736_v55  ;;  %v2738_v16 = vpop.permute.xlu1 %735  ;;  %v4044_v55 = vld [vmem:[#allocation46_spill] sm:$0xff] }
 0x193   : > { %856 = vrot.lane.b32.xlu0 %v2131_v62, %s1804_s29  ;;  %860 = vrot.lane.b32.xlu2 %v2160_v49, %s1804_s29 }
 0x194   : > { %858 = vrot.lane.b32.xlu1 %v2153_v44, %s1804_s29  ;;  %v4043_v44 = vld [vmem:[#allocation39_spill] sm:$0xff] }
 0x195   : > { %v740_v54 = vpop.permute.xlu0 %739  ;;  %v2746_v53 = vpop.permute.xlu2 %761 }
 0x196   : > { %v2748_v63 = vpop.permute.xlu1 %741 }
 0x19b   : > { %862 = vrot.lane.b32.xlu0 %v2156_v48, %s1804_s29  ;;  %866 = vrot.lane.b32.xlu2 %v2185_v58, %s1804_s29 }
 0x19c   : > { %864 = vrot.lane.b32.xlu1 %v2178_v29, %s1804_s29 }
 0x19d   : > { %v2756_v62 = vpop.permute.xlu0 %745  ;;  %v2758_v49 = vpop.permute.xlu2 %767 }
 0x19e   : > { %4039 = vst [vmem:[#allocation134_spill] sm:$0xff] %v2756_v62  ;;  %v2760_v61 = vpop.permute.xlu1 %747  ;;  %v397_v62 = vrot.slane %v2512_v35, 1 }
 0x19f   : > { %4040 = vst [vmem:[#allocation135_spill] sm:$0xff] %v2760_v61  ;;  %v4064_v61 = vld [vmem:[#allocation66_spill] sm:$0xff] }
 0x1a3   : > { %868 = vrot.lane.b32.xlu0 %v2182_v34, %s1804_s29  ;;  %872 = vrot.lane.b32.xlu2 %v2211_v37, %s1804_s29  ;;  %v4045_v34 = vld [vmem:[#allocation44_spill] sm:$0xff] }
 0x1a4   : > { %870 = vrot.lane.b32.xlu1 %v2204_v38, %s1804_s29 }
 0x1a5   : > { %v2768_v48 = vpop.permute.xlu0 %751  ;;  %v2770_v58 = vpop.permute.xlu2 %773 }
 0x1a6   : > { %4041 = vst [vmem:[#allocation136_spill] sm:$0xff] %v2768_v48  ;;  %v2772_v29 = vpop.permute.xlu1 %753  ;;  %v4047_v48 = vld [vmem:[#allocation45_spill] sm:$0xff] }
 0x1a7   : > { %4042 = vst [vmem:[#allocation137_spill] sm:$0xff] %v2772_v29  ;;  %v4056_v29 = vld [vmem:[#allocation17_spill] sm:$0xff] }
 0x1ab   : > { %874 = vrot.lane.b32.xlu0 %v4043_v44, %s1804_s29  ;;  %878 = vrot.lane.b32.xlu2 %v4044_v55, %s1804_s29  ;;  %v4049_v44 = vld [vmem:[#allocation50_spill] sm:$0xff]  ;;  %v396_v55 = vrot.slane %v2509_v52, 1 }
 0x1ac   : > { %876 = vrot.lane.b32.xlu1 %v4045_v34, %s1804_s29 }
 0x1ad   : > { %v2780_v47 = vpop.permute.xlu0 %757  ;;  %v2782_v37 = vpop.permute.xlu2 %779  ;;  %v2801_v13 = vsel %vm308_vm0, %v396_v55, %v397_v62  ;;  %v2817_v55 = vsel %vm308_vm0, %v397_v62, %v2512_v35  ;;  %v4060_v35 = vld [vmem:[#allocation62_spill] sm:$0xff] }
 0x1ae   : > { %4046 = vst [vmem:[#allocation138_spill] sm:$0xff] %v2780_v47  ;;  %v2784_v38 = vpop.permute.xlu1 %759 }
 0x1af   : > { %4051 = vst [vmem:[#allocation140_spill] sm:$0xff] %v2801_v13 }
 0x1b0   : > { %4055 = vst [vmem:[#allocation142_spill] sm:$0xff] %v2817_v55 }
 0x1b3   : > { %880 = vrot.lane.b32.xlu0 %v4047_v48, %s1804_s29  ;;  %884 = vrot.lane.b32.xlu2 %v4048_v14, %s1804_s29  ;;  %v4052_v48 = vld [vmem:[#allocation51_spill] sm:$0xff]  ;;  %v4053_v14 = vld [vmem:[#allocation56_spill] sm:$0xff] }
 0x1b4   : > { %882 = vrot.lane.b32.xlu1 %v4049_v44, %s1804_s29 }
 0x1b5   : > { %v2794_v34 = vpop.permute.xlu0 %763  ;;  %v2796_v47 = vpop.permute.xlu2 %785 }
 0x1b6   : > { %4050 = vst [vmem:[#allocation139_spill] sm:$0xff] %v2796_v47  ;;  %v2798_v41 = vpop.permute.xlu1 %765 }
 0x1bb   : > { %886 = vrot.lane.b32.xlu0 %v4052_v48, %s1804_s29  ;;  %890 = vrot.lane.b32.xlu2 %v2801_v13, %s1804_s29  ;;  %v4057_v48 = vld [vmem:[#allocation58_spill] sm:$0xff]  ;;  %v4058_v13 = vld [vmem:[#allocation60_spill] sm:$0xff] }
 0x1bc   : > { %888 = vrot.lane.b32.xlu1 %v4053_v14, %s1804_s29  ;;  %v1217_v32 = vsel %vm1216_vm2, %v4057_v48, %v4056_v29  ;;  %v4059_v14 = vld [vmem:[#allocation64_spill] sm:$0xff] }
 0x1bd   : > { %v2809_v44 = vpop.permute.xlu0 %769  ;;  %v2811_v52 = vpop.permute.xlu2 %791  ;;  %v1250_v9 = vsel %vm1249_vm3, %v1217_v32, %v4058_v13 }
 0x1be   : > { %4054 = vst [vmem:[#allocation141_spill] sm:$0xff] %v2811_v52  ;;  %v2813_v11 = vpop.permute.xlu1 %771  ;;  %v1283_v62 = vsel %vm1282_vm4, %v1250_v9, %v2608_v7  ;;  %v4062_v52 = vld [vmem:[#allocation25_spill] sm:$0xff]  ;;  %v4065_v7 = vld [vmem:[#allocation63_spill] sm:$0xff] }
 0x1bf   : > { %v1316_v29 = vsel %vm1315_vm6, %v1283_v62, %v734_v46  ;;  %v4066_v46 = vld [vmem:[#allocation70_spill] sm:$0xff] }
 0x1c3   : > { %892 = vrot.lane.b32.xlu0 %v2817_v55, %s1804_s29  ;;  %929 = vrot.lane.b32.xlu2 %v4059_v14, %s1805_s30  ;;  %v4063_v14 = vld [vmem:[#allocation57_spill] sm:$0xff] }
 0x1c4   : > { %927 = vrot.lane.b32.xlu1 %v4060_v35, %s1805_s30  ;;  %v1220_v40 = vsel %vm1216_vm2, %v4063_v14, %v4062_v52 }
 0x1c5   : > { %v2833_v5 = vpop.permute.xlu0 %775  ;;  %v831_v13 = vpop.permute.xlu2 %830  ;;  %v1253_v9 = vsel %vm1249_vm3, %v1220_v40, %v4064_v61  ;;  %v4069_v61 = vld [vmem:[#allocation69_spill] sm:$0xff] }
 0x1c6   : > { %v2835_v32 = vpop.permute.xlu1 %777  ;;  %v2838_v55 = vsel %vm1348_vm5, %v1316_v29, %v831_v13  ;;  %v1286_v62 = vsel %vm1282_vm4, %v1253_v9, %v2620_v10  ;;  %v4071_v10 = vld [vmem:[#allocation74_spill] sm:$0xff] }
 0x1c7   : > { %4061 = vst [vmem:[#allocation17_spill] sm:$0xff] %v2838_v55  ;;  %v1319_v29 = vsel %vm1315_vm6, %v1286_v62, %v740_v54 }
 0x1cb   : > { %931 = vrot.lane.b32.xlu0 %v4065_v7, %s1805_s30  ;;  %935 = vrot.lane.b32.xlu2 %v4066_v46, %s1805_s30  ;;  %v4070_v46 = vld [vmem:[#allocation76_spill] sm:$0xff]  ;;  %v4074_v7 = vld [vmem:[#allocation75_spill] sm:$0xff] }
 0x1cc   : > { %933 = vrot.lane.b32.xlu1 %v4067_v27, %s1805_s30  ;;  %v4083_v27 = vld [vmem:[#allocation88_spill] sm:$0xff] }
 0x1cd   : > { %v2854_v13 = vpop.permute.xlu0 %781  ;;  %v837_v52 = vpop.permute.xlu2 %836 }
 0x1ce   : > { %v2856_v55 = vpop.permute.xlu1 %783  ;;  %v2859_v40 = vsel %vm1348_vm5, %v1319_v29, %v837_v52  ;;  %v4075_v29 = vld [vmem:[#allocation82_spill] sm:$0xff]  ;;  %v4076_v52 = vld [vmem:[#allocation80_spill] sm:$0xff] }
 0x1cf   : > { %4068 = vst [vmem:[#allocation58_spill] sm:$0xff] %v2859_v40 }
 0x1d3   : > { %937 = vrot.lane.b32.xlu0 %v4069_v61, %s1805_s30  ;;  %941 = vrot.lane.b32.xlu2 %v4070_v46, %s1805_s30 }
 0x1d4   : > { %939 = vrot.lane.b32.xlu1 %v4071_v10, %s1805_s30  ;;  %v4079_v10 = vld [vmem:[#allocation23_spill] sm:$0xff] }
 0x1d5   : > { %v2867_v9 = vpop.permute.xlu0 %787  ;;  %v2869_v54 = vpop.permute.xlu2 %842 }
 0x1d6   : > { %4072 = vst [vmem:[#allocation60_spill] sm:$0xff] %v2869_v54  ;;  %v2871_v62 = vpop.permute.xlu1 %789  ;;  %v1218_v54 = vsel %vm1216_vm2, %v4063_v14, %v4079_v10  ;;  %v4085_v14 = vld [vmem:[#allocation86_spill] sm:$0xff] }
 0x1d7   : > { %4073 = vst [vmem:[#allocation62_spill] sm:$0xff] %v2871_v62  ;;  %v4080_v62 = vld [vmem:[#allocation19_spill] sm:$0xff]  ;;  %v1251_v6 = vsel %vm1249_vm3, %v1218_v54, %v4081_v4 }
 0x1d8   : > { %v1284_v47 = vsel %vm1282_vm4, %v1251_v6, %v2570_v51  ;;  %v4088_v6 = vld [vmem:[#allocation47_spill] sm:$0xff] }
 0x1d9   : > { %v1317_v4 = vsel %vm1315_vm6, %v1284_v47, %v2738_v16  ;;  %v4090_v16 = vld [vmem:[#allocation87_spill] sm:$0xff] }
 0x1db   : > { %943 = vrot.lane.b32.xlu0 %v4074_v7, %s1805_s30  ;;  %947 = vrot.lane.b32.xlu2 %v4075_v29, %s1805_s30  ;;  %v1219_v7 = vsel %vm1216_vm2, %v4057_v48, %v4080_v62 }
 0x1dc   : > { %945 = vrot.lane.b32.xlu1 %v4076_v52, %s1805_s30 }
 0x1dd   : > { %v2879_v61 = vpop.permute.xlu0 %793  ;;  %v2881_v46 = vpop.permute.xlu2 %848 }
 0x1de   : > { %4077 = vst [vmem:[#allocation25_spill] sm:$0xff] %v2881_v46  ;;  %v2883_v40 = vpop.permute.xlu1 %795  ;;  %v4084_v46 = vld [vmem:[#allocation85_spill] sm:$0xff] }
 0x1df   : > { %4078 = vst [vmem:[#allocation57_spill] sm:$0xff] %v2883_v40  ;;  %v1252_v40 = vsel %vm1249_vm3, %v1219_v7, %v4084_v46 }
 0x1e0   : > { %v1285_v48 = vsel %vm1282_vm4, %v1252_v40, %v2616_v8  ;;  %v1232_v8 = vsel %vm1216_vm2, %v4082_v3, %v4088_v6  ;;  %v4089_v40 = vld [vmem:[#allocation90_spill] sm:$0xff]  ;;  %v4096_v6 = vld [vmem:[#allocation53_spill] sm:$0xff] }
 0x1e1   : > { %v1318_v62 = vsel %vm1315_vm6, %v1285_v48, %v2702_v31  ;;  %v1265_v47 = vsel %vm1249_vm3, %v1232_v8, %v4089_v40  ;;  %v4092_v48 = vld [vmem:[#allocation92_spill] sm:$0xff]  ;;  %v1235_v8 = vsel %vm1216_vm2, %v4090_v16, %v4096_v6 }
 0x1e2   : > { %v1298_v31 = vsel %vm1282_vm4, %v1265_v47, %v2668_v22  ;;  %v4097_v40 = vld [vmem:[#allocation96_spill] sm:$0xff]  ;;  %v4098_v47 = vld [vmem:[#allocation93_spill] sm:$0xff] }
 0x1e3   : > { %949 = vrot.lane.b32.xlu0 %v4082_v3, %s1805_s30  ;;  %953 = vrot.lane.b32.xlu2 %v4083_v27, %s1805_s30  ;;  %v1268_v22 = vsel %vm1249_vm3, %v1235_v8, %v4097_v40  ;;  %v4104_v40 = vld [vmem:[#allocation59_spill] sm:$0xff] }
 0x1e4   : > { %951 = vrot.lane.b32.xlu1 %v4085_v14, %s1805_s30 }
 0x1e5   : > { %v833_v10 = vpop.permute.xlu0 %832  ;;  %v2907_v54 = vpop.permute.xlu2 %854 }
 0x1e6   : > { %4086 = vst [vmem:[#allocation66_spill] sm:$0xff] %v2907_v54  ;;  %v2912_v7 = vsel %vm1348_vm5, %v1317_v4, %v833_v10  ;;  %v835_v46 = vpop.permute.xlu1 %834  ;;  %v4091_v54 = vld [vmem:[#allocation94_spill] sm:$0xff]  ;;  %v1331_v4 = vsel %vm1315_vm6, %v1298_v31, %v2794_v34  ;;  %v4099_v34 = vld [vmem:[#allocation100_spill] sm:$0xff]  ;;  %v1301_v31 = vsel %vm1282_vm4, %v1268_v22, %v2680_v25  ;;  %v4106_v22 = vld [vmem:[#allocation99_spill] sm:$0xff] }
 0x1e7   : > { %v2915_v51 = vsel %vm1348_vm5, %v1318_v62, %v835_v46 }
 0x1e8   : > { %4087 = vst [vmem:[#allocation82_spill] sm:$0xff] %v2915_v51  ;;  %v4105_v51 = vld [vmem:[#allocation102_spill] sm:$0xff] }
 0x1eb   : > { %955 = vrot.lane.b32.xlu0 %v4090_v16, %s1805_s30  ;;  %959 = vrot.lane.b32.xlu2 %v4091_v54, %s1805_s30 }
 0x1ec   : > { %957 = vrot.lane.b32.xlu1 %v4092_v48, %s1805_s30 }
 0x1ed   : > { %v2932_v10 = vpop.permute.xlu0 %838  ;;  %v861_v3 = vpop.permute.xlu2 %860 }
 0x1ee   : > { %4093 = vst [vmem:[#allocation80_spill] sm:$0xff] %v2932_v10  ;;  %v2934_v62 = vpop.permute.xlu1 %840  ;;  %v2937_v46 = vsel %vm1348_vm5, %v1331_v4, %v861_v3  ;;  %v1334_v4 = vsel %vm1315_vm6, %v1301_v31, %v2809_v44  ;;  %v4107_v44 = vld [vmem:[#allocation106_spill] sm:$0xff]  ;;  %v4115_v10 = vld [vmem:[#allocation108_spill] sm:$0xff] }
 0x1ef   : > { %4094 = vst [vmem:[#allocation23_spill] sm:$0xff] %v2934_v62  ;;  %v4100_v62 = vld [vmem:[#allocation98_spill] sm:$0xff] }
 0x1f0   : > { %4095 = vst [vmem:[#allocation19_spill] sm:$0xff] %v2937_v46  ;;  %v1238_v46 = vsel %vm1216_vm2, %v4098_v47, %v4104_v40 }
 0x1f1   : > { %v1271_v25 = vsel %vm1249_vm3, %v1238_v46, %v4105_v51  ;;  %v4111_v46 = vld [vmem:[#allocation43_spill] sm:$0xff] }
 0x1f2   : > { %v1304_v31 = vsel %vm1282_vm4, %v1271_v25, %v2692_v30  ;;  %v4113_v25 = vld [vmem:[#allocation24_spill] sm:$0xff] }
 0x1f3   : > { %961 = vrot.lane.b32.xlu0 %v4098_v47, %s1805_s30  ;;  %965 = vrot.lane.b32.xlu2 %v4099_v34, %s1805_s30 }
 0x1f4   : > { %963 = vrot.lane.b32.xlu1 %v4100_v62, %s1805_s30 }
 0x1f5   : > { %v2954_v3 = vpop.permute.xlu0 %844  ;;  %v867_v16 = vpop.permute.xlu2 %866 }
 0x1f6   : > { %4101 = vst [vmem:[#allocation83_spill] sm:$0xff] %v2954_v3  ;;  %v2956_v6 = vpop.permute.xlu1 %846  ;;  %v2959_v8 = vsel %vm1348_vm5, %v1334_v4, %v867_v16  ;;  %v1337_v4 = vsel %vm1315_vm6, %v1304_v31, %v2833_v5  ;;  %v4112_v3 = vld [vmem:[#allocation65_spill] sm:$0xff]  ;;  %v1231_v5 = vsel %vm1216_vm2, %v4075_v29, %v4113_v25  ;;  %v4114_v31 = vld [vmem:[#allocation107_spill] sm:$0xff] }
 0x1f7   : > { %4102 = vst [vmem:[#allocation81_spill] sm:$0xff] %v2956_v6  ;;  %v4108_v6 = vld [vmem:[#allocation104_spill] sm:$0xff]  ;;  %v1241_v30 = vsel %vm1216_vm2, %v4106_v22, %v4112_v3 }
 0x1f8   : > { %4103 = vst [vmem:[#allocation88_spill] sm:$0xff] %v2959_v8  ;;  %v1230_v8 = vsel %vm1216_vm2, %v4076_v52, %v4111_v46  ;;  %v4118_v52 = vld [vmem:[#allocation109_spill] sm:$0xff] }
 0x1f9   : > { %v1264_v46 = vsel %vm1249_vm3, %v1231_v5, %v4118_v52 }
 0x1fb   : > { %967 = vrot.lane.b32.xlu0 %v4106_v22, %s1805_s30  ;;  %971 = vrot.lane.b32.xlu2 %v4107_v44, %s1805_s30 }
 0x1fc   : > { %969 = vrot.lane.b32.xlu1 %v4108_v6, %s1805_s30 }
 0x1fd   : > { %v2976_v16 = vpop.permute.xlu0 %850  ;;  %v873_v47 = vpop.permute.xlu2 %872 }
 0x1fe   : > { %4109 = vst [vmem:[#allocation85_spill] sm:$0xff] %v2976_v16  ;;  %v2978_v40 = vpop.permute.xlu1 %852  ;;  %v2981_v51 = vsel %vm1348_vm5, %v1337_v4, %v873_v47  ;;  %v1263_v16 = vsel %vm1249_vm3, %v1230_v8, %v4114_v31  ;;  %v4116_v4 = vld [vmem:[#allocation105_spill] sm:$0xff]  ;;  %v4117_v47 = vld [vmem:[#allocation114_spill] sm:$0xff]  ;;  %v4119_v8 = vld [vmem:[#allocation112_spill] sm:$0xff] }
 0x1ff   : > { %4110 = vst [vmem:[#allocation86_spill] sm:$0xff] %v2978_v40  ;;  %v1274_v40 = vsel %vm1249_vm3, %v1241_v30, %v4115_v10  ;;  %v1296_v3 = vsel %vm1282_vm4, %v1263_v16, %v2618_v12  ;;  %v1297_v10 = vsel %vm1282_vm4, %v1264_v46, %v2664_v20  ;;  %v4120_v31 = vld [vmem:[#allocation49_spill] sm:$0xff]  ;;  %v4122_v46 = vld [vmem:[#allocation30_spill] sm:$0xff] }
 0x200   : > { %v1307_v29 = vsel %vm1282_vm4, %v1274_v40, %v2704_v17  ;;  %v1329_v22 = vsel %vm1315_vm6, %v1296_v3, %v2784_v38  ;;  %v1330_v12 = vsel %vm1315_vm6, %v1297_v10, %v2746_v53  ;;  %v1233_v38 = vsel %vm1216_vm2, %v4085_v14, %v4120_v31  ;;  %v4125_v14 = vld [vmem:[#allocation116_spill] sm:$0xff] }
 0x201   : > { %v1340_v30 = vsel %vm1315_vm6, %v1307_v29, %v2854_v13  ;;  %v4121_v13 = vld [vmem:[#allocation71_spill] sm:$0xff]  ;;  %v1234_v53 = vsel %vm1216_vm2, %v4083_v27, %v4122_v46  ;;  %v1266_v3 = vsel %vm1249_vm3, %v1233_v38, %v2533_v36  ;;  %v4128_v46 = vld [vmem:[#allocation36_spill] sm:$0xff] }
 0x202   : > { %v1244_v52 = vsel %vm1216_vm2, %v4116_v4, %v4121_v13  ;;  %v4123_v29 = vld [vmem:[#allocation115_spill] sm:$0xff] }
 0x203   : > { %973 = vrot.lane.b32.xlu0 %v4116_v4, %s1805_s30  ;;  %977 = vrot.lane.b32.xlu2 %v4117_v47, %s1805_s30  ;;  %v1277_v10 = vsel %vm1249_vm3, %v1244_v52, %v4123_v29  ;;  %v1299_v4 = vsel %vm1282_vm4, %v1266_v3, %v2630_v15  ;;  %v4126_v13 = vld [vmem:[#allocation55_spill] sm:$0xff] }
 0x204   : > { %975 = vrot.lane.b32.xlu1 %v4119_v8, %s1805_s30  ;;  %v1310_v27 = vsel %vm1282_vm4, %v1277_v10, %v2716_v39 }
 0x205   : > { %v857_v25 = vpop.permute.xlu0 %856  ;;  %v879_v5 = vpop.permute.xlu2 %878 }
 0x206   : > { %v3017_v16 = vsel %vm1348_vm5, %v1329_v22, %v857_v25  ;;  %v859_v17 = vpop.permute.xlu1 %858  ;;  %v3020_v40 = vsel %vm1348_vm5, %v1340_v30, %v879_v5  ;;  %v4124_v22 = vld [vmem:[#allocation113_spill] sm:$0xff]  ;;  %v1267_v30 = vsel %vm1249_vm3, %v1234_v53, %v4125_v14  ;;  %v1332_v25 = vsel %vm1315_vm6, %v1299_v4, %v2798_v41  ;;  %v4130_v14 = vld [vmem:[#allocation42_spill] sm:$0xff]  ;;  %v1692_v4 = vld [vmem:[%s1879_s24 + $0x10] sm:$0xff] }
 0x207   : > { %v3023_v20 = vsel %vm1348_vm5, %v1330_v12, %v859_v17  ;;  %v1300_v36 = vsel %vm1282_vm4, %v1267_v30, %v2676_v23  ;;  %v1343_v5 = vsel %vm1315_vm6, %v1310_v27, %v2867_v9  ;;  %v1236_v41 = vsel %vm1216_vm2, %v4092_v48, %v4126_v13  ;;  %v4127_v9 = vld [vmem:[#allocation77_spill] sm:$0xff]  ;;  %v4132_v13 = vld [vmem:[#allocation67_spill] sm:$0xff] }
 0x208   : > { %v1333_v15 = vsel %vm1315_vm6, %v1300_v36, %v2758_v49  ;;  %v1247_v52 = vsel %vm1216_vm2, %v4124_v22, %v4127_v9  ;;  %v1237_v49 = vsel %vm1216_vm2, %v4091_v54, %v4128_v46  ;;  %v1269_v53 = vsel %vm1249_vm3, %v1236_v41, %v2556_v43  ;;  %v1693_v27 = vld [vmem:[%s1879_s24 + $0x20] sm:$0xff] }
 0x209   : > { %v1280_v3 = vsel %vm1249_vm3, %v1247_v52, %v2558_v50  ;;  %v1270_v48 = vsel %vm1249_vm3, %v1237_v49, %v2560_v56  ;;  %v1302_v29 = vsel %vm1282_vm4, %v1269_v53, %v2642_v18  ;;  %v1240_v30 = vsel %vm1216_vm2, %v4099_v34, %v4130_v14  ;;  %v4133_v41 = vld [vmem:[#allocation89_spill] sm:$0xff]  ;;  %v4134_v52 = vld [vmem:[#allocation48_spill] sm:$0xff]  ;;  %v1695_v53 = vld [vmem:[%s1879_s24 + $0x28] sm:$0xff] }
 0x20a   : > { %v1313_v54 = vsel %vm1282_vm4, %v1280_v3, %v2728_v45  ;;  %v1303_v43 = vsel %vm1282_vm4, %v1270_v48, %v2688_v26  ;;  %v1273_v36 = vsel %vm1249_vm3, %v1240_v30, %v2572_v28  ;;  %v1243_v46 = vsel %vm1216_vm2, %v4107_v44, %v4134_v52  ;;  %v1697_v48 = vld [vmem:[%s1879_s24 + $0x30] sm:$0xff]  ;;  %v4141_v30 = vld [vmem:[#allocation54_spill] sm:$0xff] }
 0x20b   : > { %979 = vrot.lane.b32.xlu0 %v4124_v22, %s1805_s30  ;;  %983 = vrot.lane.b32.xlu2 %v2545_v42, %s1805_s30  ;;  %v1346_v56 = vsel %vm1315_vm6, %v1313_v54, %v2879_v61  ;;  %v1336_v18 = vsel %vm1315_vm6, %v1303_v43, %v2770_v58 }
 0x20c   : > { %981 = vrot.lane.b32.xlu1 %v2548_v57, %s1805_s30 }
 0x20d   : > { %v863_v12 = vpop.permute.xlu0 %862  ;;  %v885_v17 = vpop.permute.xlu2 %884 }
 0x20e   : > { %v3059_v31 = vsel %vm1348_vm5, %v1332_v25, %v863_v12  ;;  %v865_v39 = vpop.permute.xlu1 %864  ;;  %v3062_v38 = vsel %vm1348_vm5, %v1343_v5, %v885_v17  ;;  %v1694_v25 = vld [vmem:[%s1879_s24 + $0x18] sm:$0xff] }
 0x20f   : > { %v3065_v23 = vsel %vm1348_vm5, %v1333_v15, %v865_v39  ;;  %v4131_v39 = vld [vmem:[#allocation5_spill] sm:$0xff] }
 0x213   : > { %985 = vrot.lane.b32.xlu0 %v2541_v60, %s1805_s30  ;;  %989 = vrot.lane.b32.xlu2 %v2541_v60, %s1805_s30  ;;  %v1335_v60 = vsel %vm1315_vm6, %v1302_v29, %v2813_v11  ;;  %v4129_v11 = vld [vmem:[#allocation61_spill] sm:$0xff]  ;;  %v4135_v29 = vld [vmem:[#allocation80_spill] sm:$0xff] }
 0x214   : > { %987 = vrot.lane.b32.xlu1 %v2545_v42, %s1805_s30  ;;  %v1239_v61 = vsel %vm1216_vm2, %v4100_v62, %v4129_v11 }
 0x215   : > { %v869_v50 = vpop.permute.xlu0 %868  ;;  %v891_v10 = vpop.permute.xlu2 %890  ;;  %v1272_v58 = vsel %vm1249_vm3, %v1239_v61, %v2568_v59  ;;  %v1306_v59 = vsel %vm1282_vm4, %v1273_v36, %v2700_v19  ;;  %v4140_v61 = vld [vmem:[#allocation95_spill] sm:$0xff]  ;;  %v4143_v36 = vld [vmem:[#allocation118_spill] sm:$0xff] }
 0x216   : > { %v3101_v45 = vsel %vm1348_vm5, %v1335_v60, %v869_v50  ;;  %v871_v42 = vpop.permute.xlu1 %870  ;;  %v3104_v22 = vsel %vm1348_vm5, %v1346_v56, %v891_v10  ;;  %v1305_v62 = vsel %vm1282_vm4, %v1272_v58, %v2654_v21  ;;  %v1339_v17 = vsel %vm1315_vm6, %v1306_v59, %v2782_v37  ;;  %v4138_v10 = vld [vmem:[#allocation68_spill] sm:$0xff]  ;;  %v1699_v59 = vld [vmem:[%s1879_s24 + $0x50] sm:$0xff] }
 0x217   : > { %v3107_v26 = vsel %vm1348_vm5, %v1336_v18, %v871_v42  ;;  %v1338_v34 = vsel %vm1315_vm6, %v1305_v62, %v2835_v32  ;;  %v1221_v32 = vsel %vm1216_vm2, %v4060_v35, %v4131_v39  ;;  %v1242_v37 = vsel %vm1216_vm2, %v4108_v6, %v4132_v13  ;;  %v1696_v35 = vld [vmem:[%s1879_s24 + $0x38] sm:$0xff]  ;;  %v4139_v42 = vld [vmem:[#allocation73_spill] sm:$0xff]  ;;  %v4147_v39 = vld [vmem:[#allocation131_spill] sm:$0xff] }
 0x218   : > { %v1254_v9 = vsel %vm1249_vm3, %v1221_v32, %v4133_v41  ;;  %v1276_v6 = vsel %vm1249_vm3, %v1243_v46, %v2584_v2  ;;  %v1245_v11 = vsel %vm1216_vm2, %v4119_v8, %v4139_v42  ;;  %v1246_v58 = vsel %vm1216_vm2, %v4117_v47, %v4141_v30  ;;  %v4144_v8 = vld [vmem:[#allocation119_spill] sm:$0xff]  ;;  %v4148_v13 = vld [vmem:[#allocation62_spill] sm:$0xff]  ;;  %v4158_v42 = vld [vmem:[#allocation137_spill] sm:$0xff] }
 0x219   : > { %v1287_v49 = vsel %vm1282_vm4, %v1254_v9, %v2582_v1  ;;  %v4149_v41 = vld [vmem:[#allocation83_spill] sm:$0xff] }
 0x21a   : > { %v1320_v44 = vsel %vm1315_vm6, %v1287_v49, %v2748_v63 }
 0x21b   : > { %1023 = vrot.lane.b32.xlu0 %v1692_v4, %s1806_s2  ;;  %1027 = vrot.lane.b32.xlu2 %v1693_v27, %s1806_s2  ;;  %v1353_v54 = vsel %vm1348_vm5, %v1320_v44, %v4135_v29  ;;  %v4142_v4 = vld [vmem:[#allocation117_spill] sm:$0xff] }
 0x21c   : > { %1025 = vrot.lane.b32.xlu1 %v1694_v25, %s1806_s2  ;;  %v1278_v27 = vsel %vm1249_vm3, %v1245_v11, %v4142_v4  ;;  %v1698_v25 = vld [vmem:[%s1879_s24 + $0x40] sm:$0xff] }
 0x21d   : > { %v875_v5 = vpop.permute.xlu0 %874  ;;  %v930_v12 = vpop.permute.xlu2 %929  ;;  %v4151_v44 = vld [vmem:[#allocation37_spill] sm:$0xff] }
 0x21e   : > { %v3134_v28 = vsel %vm1348_vm5, %v1338_v34, %v875_v5  ;;  %v877_v21 = vpop.permute.xlu1 %876  ;;  %v3138_v15 = vsel %vm1381_vm7, %v2912_v7, %v930_v12  ;;  %v1275_v7 = vsel %vm1249_vm3, %v1242_v37, %v2580_v0  ;;  %v1309_v0 = vsel %vm1282_vm4, %v1276_v6, %v2712_v33  ;;  %v4145_v5 = vld [vmem:[#allocation128_spill] sm:$0xff] }
 0x21f   : > { %v3141_v19 = vsel %vm1348_vm5, %v1339_v17, %v877_v21  ;;  %v1308_v3 = vsel %vm1282_vm4, %v1275_v7, %v2666_v24  ;;  %v4136_v24 = vld [vmem:[#allocation139_spill] sm:$0xff]  ;;  %v1279_v34 = vsel %vm1249_vm3, %v1246_v58, %v4144_v8  ;;  %v1311_v12 = vsel %vm1282_vm4, %v1278_v27, %v4145_v5  ;;  %v1700_v21 = vld [vmem:[%s1879_s24 + $0x48] sm:$0xff]  ;;  %v4150_v7 = vld [vmem:[#allocation141_spill] sm:$0xff] }
 0x220   : > { %v1341_v1 = vsel %vm1315_vm6, %v1308_v3, %v2856_v55  ;;  %v1342_v60 = vsel %vm1315_vm6, %v1309_v0, %v4136_v24  ;;  %v4137_v55 = vld [vmem:[#allocation31_spill] sm:$0xff]  ;;  %v1312_v32 = vsel %vm1282_vm4, %v1279_v34, %v4147_v39  ;;  %v1344_v37 = vsel %vm1315_vm6, %v1311_v12, %v4148_v13  ;;  %v4160_v58 = vld [vmem:[#allocation85_spill] sm:$0xff]  ;;  %v4162_v39 = vld [vmem:[#allocation82_spill] sm:$0xff] }
 0x221   : > { %v1224_v18 = vsel %vm1216_vm2, %v4138_v10, %v4137_v55  ;;  %v4146_v17 = vld [vmem:[#allocation135_spill] sm:$0xff]  ;;  %v1345_v49 = vsel %vm1315_vm6, %v1312_v32, %v4150_v7  ;;  %v1701_v55 = vld [vmem:[%s1879_s24 + $0x58] sm:$0xff]  ;;  %v1702_v10 = vld [vmem:[%s1879_s24 + $0x68] sm:$0xff] }
 0x222   : > { %v1257_v14 = vsel %vm1249_vm3, %v1224_v18, %v4140_v61  ;;  %v4157_v18 = vld [vmem:[#allocation129_spill] sm:$0xff]  ;;  %v1704_v5 = vld [vmem:[%s1879_s24 + $0x70] sm:$0xff] }
 0x223   : > { %1029 = vrot.lane.b32.xlu0 %v1695_v53, %s1806_s2  ;;  %1033 = vrot.lane.b32.xlu2 %v1696_v35, %s1806_s2  ;;  %v1290_v62 = vsel %vm1282_vm4, %v1257_v14, %v4143_v36  ;;  %v1703_v61 = vld [vmem:[%s1879_s24 + $0x60] sm:$0xff] }
 0x224   : > { %1031 = vrot.lane.b32.xlu1 %v1697_v48, %s1806_s2  ;;  %v1323_v47 = vsel %vm1315_vm6, %v1290_v62, %v4146_v17  ;;  %v4152_v48 = vld [vmem:[#allocation74_spill] sm:$0xff]  ;;  %v4159_v14 = vld [vmem:[#allocation57_spill] sm:$0xff]  ;;  %v1706_v17 = vld [vmem:[%s1879_s24 + $0x78] sm:$0xff] }
 0x225   : > { %v881_v2 = vpop.permute.xlu0 %880  ;;  %v936_v43 = vpop.permute.xlu2 %935  ;;  %v1356_v9 = vsel %vm1348_vm5, %v1323_v47, %v4149_v41  ;;  %v1227_v0 = vsel %vm1216_vm2, %v4152_v48, %v4151_v44  ;;  %v4161_v8 = vld [vmem:[#allocation17_spill] sm:$0xff]  ;;  %v4163_v41 = vld [vmem:[#allocation58_spill] sm:$0xff]  ;;  %v4168_v48 = vld [vmem:[#allocation91_spill] sm:$0xff] }
 0x226   : > { %v3179_v63 = vsel %vm1348_vm5, %v1341_v1, %v881_v2  ;;  %v883_v56 = vpop.permute.xlu1 %882  ;;  %v3182_v33 = vsel %vm1381_vm7, %v1353_v54, %v936_v43  ;;  %v4153_v1 = vld [vmem:[#allocation79_spill] sm:$0xff]  ;;  %v4154_v54 = vld [vmem:[#allocation101_spill] sm:$0xff]  ;;  %v4155_v43 = vld [vmem:[#allocation120_spill] sm:$0xff] }
 0x227   : > { %v3185_v50 = vsel %vm1348_vm5, %v1342_v60, %v883_v56  ;;  %v1248_v29 = vsel %vm1216_vm2, %v2548_v57, %v4153_v1  ;;  %v1260_v2 = vsel %vm1249_vm3, %v1227_v0, %v4154_v54  ;;  %v4156_v60 = vld [vmem:[#allocation121_spill] sm:$0xff]  ;;  %v4169_v1 = vld [vmem:[#allocation72_spill] sm:$0xff] }
 0x228   : > { %v1281_v24 = vsel %vm1249_vm3, %v1248_v29, %v4155_v43  ;;  %v1293_v56 = vsel %vm1282_vm4, %v1260_v2, %v4156_v60  ;;  %v1705_v12 = vld [vmem:[%s1879_s24 + $0x80] sm:$0xff]  ;;  %v1707_v2 = vld [vmem:[%s1879_s24 + $0x88] sm:$0xff]  ;;  %v1708_v43 = vld [vmem:[%s1879_s24 + $0x98] sm:$0xff] }
 0x229   : > { %v1314_v57 = vsel %vm1282_vm4, %v1281_v24, %v4157_v18  ;;  %v1326_v11 = vsel %vm1315_vm6, %v1293_v56, %v4158_v42  ;;  %v4171_v24 = vld [vmem:[#allocation123_spill] sm:$0xff]  ;;  %v4172_v56 = vld [vmem:[#allocation130_spill] sm:$0xff] }
 0x22a   : > { %v1347_v30 = vsel %vm1315_vm6, %v1314_v57, %v4159_v14  ;;  %v1359_v4 = vsel %vm1348_vm5, %v1326_v11, %v4160_v58  ;;  %v4173_v18 = vld [vmem:[#allocation134_spill] sm:$0xff]  ;;  %v4174_v42 = vld [vmem:[#allocation23_spill] sm:$0xff] }
 0x22b   : > { %1035 = vrot.lane.b32.xlu0 %v1698_v25, %s1806_s2  ;;  %1039 = vrot.lane.b32.xlu2 %v1699_v59, %s1806_s2 }
 0x22c   : > { %1037 = vrot.lane.b32.xlu1 %v1700_v21, %s1806_s2 }
 0x22d   : > { %v887_v52 = vpop.permute.xlu0 %886  ;;  %v942_v46 = vpop.permute.xlu2 %941 }
 0x22e   : > { %v3223_v53 = vsel %vm1348_vm5, %v1344_v37, %v887_v52  ;;  %v889_v35 = vpop.permute.xlu1 %888  ;;  %v3226_v6 = vsel %vm1381_vm7, %v1356_v9, %v942_v46  ;;  %v4164_v52 = vld [vmem:[#allocation9_spill] sm:$0xff]  ;;  %v4165_v46 = vld [vmem:[#allocation64_spill] sm:$0xff] }
 0x22f   : > { %v3229_v3 = vsel %vm1348_vm5, %v1345_v49, %v889_v35  ;;  %v1222_v7 = vsel %vm1216_vm2, %v4165_v46, %v4164_v52  ;;  %v4166_v49 = vld [vmem:[#allocation29_spill] sm:$0xff]  ;;  %v4167_v35 = vld [vmem:[#allocation63_spill] sm:$0xff]  ;;  %v4182_v46 = vld [vmem:[#allocation124_spill] sm:$0xff] }
 0x230   : > { %v1223_v44 = vsel %vm1216_vm2, %v4167_v35, %v4166_v49  ;;  %v1255_v0 = vsel %vm1249_vm3, %v1222_v7, %v4168_v48  ;;  %v1710_v7 = vld [vmem:[%s1879_s24 + $0xa0] sm:$0xff]  ;;  %v1711_v49 = vld [vmem:[%s1879_s24 + $0xb0] sm:$0xff]  ;;  %v4184_v48 = vld [vmem:[#allocation132_spill] sm:$0xff] }
 0x231   : > { %v1256_v29 = vsel %vm1249_vm3, %v1223_v44, %v4169_v1  ;;  %v4183_v35 = vld [vmem:[#allocation125_spill] sm:$0xff]  ;;  %v1712_v1 = vld [vmem:[%s1879_s24 + $0xa8] sm:$0xff] }
 0x232   : > { %v1289_v60 = vsel %vm1282_vm4, %v1256_v29, %v4171_v24  ;;  %v4185_v29 = vld [vmem:[#allocation136_spill] sm:$0xff] }
 0x233   : > { %1041 = vrot.lane.b32.xlu0 %v1701_v55, %s1806_s2  ;;  %1045 = vrot.lane.b32.xlu2 %v1702_v10, %s1806_s2  ;;  %v1709_v10 = vld [vmem:[%s1879_s24 + $0x90] sm:$0xff]  ;;  %v1322_v57 = vsel %vm1315_vm6, %v1289_v60, %v4173_v18  ;;  %v4187_v60 = vld [vmem:[#allocation25_spill] sm:$0xff] }
 0x234   : > { %1043 = vrot.lane.b32.xlu1 %v1703_v61, %s1806_s2 }
 0x235   : > { %v893_v27 = vpop.permute.xlu0 %892  ;;  %v948_v36 = vpop.permute.xlu2 %947 }
 0x236   : > { %v3258_v62 = vsel %vm1348_vm5, %v1347_v30, %v893_v27  ;;  %v928_v25 = vpop.permute.xlu1 %927  ;;  %v3261_v59 = vsel %vm1381_vm7, %v1359_v4, %v948_v36  ;;  %v4175_v30 = vld [vmem:[#allocation60_spill] sm:$0xff] }
 0x237   : > { %v3265_v34 = vsel %vm1381_vm7, %v4161_v8, %v928_v25  ;;  %v1355_v58 = vsel %vm1348_vm5, %v1322_v57, %v4175_v30  ;;  %v4176_v8 = vld [vmem:[#allocation13_spill] sm:$0xff]  ;;  %v4191_v30 = vld [vmem:[#allocation75_spill] sm:$0xff] }
 0x23b   : > { %1047 = vrot.lane.b32.xlu0 %v1704_v5, %s1806_s2  ;;  %1051 = vrot.lane.b32.xlu2 %v1705_v12, %s1806_s2  ;;  %v4177_v5 = vld [vmem:[#allocation70_spill] sm:$0xff] }
 0x23c   : > { %1049 = vrot.lane.b32.xlu1 %v1706_v17, %s1806_s2  ;;  %v1225_v12 = vsel %vm1216_vm2, %v4177_v5, %v4176_v8  ;;  %v4178_v17 = vld [vmem:[#allocation35_spill] sm:$0xff]  ;;  %v4193_v5 = vld [vmem:[#allocation84_spill] sm:$0xff] }
 0x23d   : > { %v932_v47 = vpop.permute.xlu0 %931  ;;  %v954_v21 = vpop.permute.xlu2 %953 }
 0x23e   : > { %v3275_v32 = vsel %vm1381_vm7, %v4162_v39, %v932_v47  ;;  %v934_v13 = vpop.permute.xlu1 %933  ;;  %v3279_v37 = vsel %vm1381_vm7, %v3017_v16, %v954_v21  ;;  %v4170_v16 = vld [vmem:[#allocation122_spill] sm:$0xff]  ;;  %v4179_v47 = vld [vmem:[#allocation69_spill] sm:$0xff] }
 0x23f   : > { %v3283_v9 = vsel %vm1381_vm7, %v4163_v41, %v934_v13  ;;  %v1288_v54 = vsel %vm1282_vm4, %v1255_v0, %v4170_v16  ;;  %v1226_v21 = vsel %vm1216_vm2, %v4179_v47, %v4178_v17  ;;  %v4180_v39 = vld [vmem:[#allocation97_spill] sm:$0xff]  ;;  %v4181_v41 = vld [vmem:[#allocation78_spill] sm:$0xff]  ;;  %v1713_v47 = vld [vmem:[%s1879_s24 + $0xb8] sm:$0xff] }
 0x240   : > { %v1321_v55 = vsel %vm1315_vm6, %v1288_v54, %v4172_v56  ;;  %v1258_v13 = vsel %vm1249_vm3, %v1225_v12, %v4180_v39  ;;  %v1259_v52 = vsel %vm1249_vm3, %v1226_v21, %v4181_v41  ;;  %v4186_v54 = vld [vmem:[#allocation81_spill] sm:$0xff]  ;;  %v4194_v17 = vld [vmem:[#allocation126_spill] sm:$0xff]  ;;  %v4195_v39 = vld [vmem:[#allocation127_spill] sm:$0xff] }
 0x241   : > { %v1354_v11 = vsel %vm1348_vm5, %v1321_v55, %v4174_v42  ;;  %v1292_v44 = vsel %vm1282_vm4, %v1259_v52, %v4183_v35  ;;  %v4188_v42 = vld [vmem:[#allocation18_spill] sm:$0xff]  ;;  %v4196_v41 = vld [vmem:[#allocation133_spill] sm:$0xff] }
 0x242   : > { %v1325_v16 = vsel %vm1315_vm6, %v1292_v44, %v4185_v29  ;;  %v1714_v21 = vld [vmem:[%s1879_s24 + $0xc8] sm:$0xff] }
 0x243   : > { %1053 = vrot.lane.b32.xlu0 %v1707_v2, %s1806_s2  ;;  %1057 = vrot.lane.b32.xlu2 %v1708_v43, %s1806_s2  ;;  %v1358_v56 = vsel %vm1348_vm5, %v1325_v16, %v4187_v60  ;;  %v1718_v60 = vld [vmem:[%s1879_s24 + $0xd8] sm:$0xff] }
 0x244   : > { %1055 = vrot.lane.b32.xlu1 %v1709_v10, %s1806_s2 }
 0x245   : > { %v938_v61 = vpop.permute.xlu0 %937  ;;  %v960_v14 = vpop.permute.xlu2 %959 }
 0x246   : > { %v3314_v4 = vsel %vm1381_vm7, %v1354_v11, %v938_v61  ;;  %v940_v27 = vpop.permute.xlu1 %939  ;;  %v3318_v36 = vsel %vm1381_vm7, %v3059_v31, %v960_v14  ;;  %v1291_v31 = vsel %vm1282_vm4, %v1258_v13, %v4182_v46  ;;  %v4189_v11 = vld [vmem:[#allocation76_spill] sm:$0xff]  ;;  %v4190_v14 = vld [vmem:[#allocation41_spill] sm:$0xff] }
 0x247   : > { %v3321_v25 = vsel %vm1381_vm7, %v1355_v58, %v940_v27  ;;  %v1324_v0 = vsel %vm1315_vm6, %v1291_v31, %v4184_v48  ;;  %v1228_v61 = vsel %vm1216_vm2, %v4189_v11, %v4188_v42  ;;  %v1229_v58 = vsel %vm1216_vm2, %v4191_v30, %v4190_v14  ;;  %v4192_v27 = vld [vmem:[#allocation103_spill] sm:$0xff]  ;;  %v1715_v46 = vld [vmem:[%s1879_s24 + $0xc0] sm:$0xff]  ;;  %v4197_v31 = vld [vmem:[#allocation138_spill] sm:$0xff] }
 0x248   : > { %v1357_v2 = vsel %vm1348_vm5, %v1324_v0, %v4186_v54  ;;  %v1261_v8 = vsel %vm1249_vm3, %v1228_v61, %v4192_v27  ;;  %v1262_v12 = vsel %vm1249_vm3, %v1229_v58, %v4193_v5  ;;  %v4199_v0 = vld [vmem:[#allocation66_spill] sm:$0xff]  ;;  %v4200_v61 = vld [vmem:[#allocation19_spill] sm:$0xff] }
 0x249   : > { %v1295_v13 = vsel %vm1282_vm4, %v1262_v12, %v4195_v39  ;;  %v1719_v30 = vld [vmem:[%s1879_s24 + $0xe8] sm:$0xff]  ;;  %v4201_v58 = vld [vmem:[#allocation111_spill] sm:$0xff] }
 0x24a   : > { %v4202_v27 = vld [vmem:[#allocation110_spill] sm:$0xff] }
 0x24b   : > { %1059 = vrot.lane.b32.xlu0 %v1710_v7, %s1806_s2  ;;  %1063 = vrot.lane.b32.xlu2 %v1711_v49, %s1806_s2  ;;  %v1328_v7 = vsel %vm1315_vm6, %v1295_v13, %v4197_v31  ;;  %v4198_v49 = vld [vmem:[#allocation86_spill] sm:$0xff]  ;;  %v4207_v31 = vld [vmem:[#allocation7_spill] sm:$0xff] }
 0x24c   : > { %1061 = vrot.lane.b32.xlu1 %v1712_v1, %s1806_s2  ;;  %v1361_v1 = vsel %vm1348_vm5, %v1328_v7, %v4199_v0  ;;  %v4210_v0 = vld [vmem:[#allocation11_spill] sm:$0xff] }
 0x24d   : > { %v944_v43 = vpop.permute.xlu0 %943  ;;  %v966_v24 = vpop.permute.xlu2 %965 }
 0x24e   : > { %v3352_v55 = vsel %vm1381_vm7, %v1357_v2, %v944_v43  ;;  %v946_v10 = vpop.permute.xlu1 %945  ;;  %v3356_v18 = vsel %vm1381_vm7, %v3101_v45, %v966_v24  ;;  %v1294_v45 = vsel %vm1282_vm4, %v1261_v8, %v4194_v17  ;;  %v1716_v43 = vld [vmem:[%s1879_s24 + $0xd0] sm:$0xff]  ;;  %v1717_v24 = vld [vmem:[%s1879_s24 + $0xe0] sm:$0xff]  ;;  %v4203_v17 = vld [vmem:[#allocation88_spill] sm:$0xff]  ;;  %s1736_s24 = scalar_lea.hbm %s1735_s23, 256 }
 0x24f   : > { %v3359_v57 = vsel %vm1381_vm7, %v1358_v56, %v946_v10  ;;  %v1327_v52 = vsel %vm1315_vm6, %v1294_v45, %v4196_v41  ;;  %p1737_p12 = scmp.ne.s32.totalorder %s1735_s23, %s1736_s24  ;;  %p1742_p2 = scmp.lt.s32.totalorder %s1740_s28, %s1736_s24 }
 0x250   : > { %v1360_v35 = vsel %vm1348_vm5, %v1327_v52, %v4198_v49  ;;  %v4205_v52 = vld [vmem:[#allocation8_spill] sm:$0xff] }
 0x251   : > { %p1738_p13 = pnand %p1737_p12, %p1859_p4  ;;  %p1743_p3 = por %p1742_p2, %p1741_p1 }
 0x253   : > { %1065 = vrot.lane.b32.xlu0 %v1713_v47, %s1806_s2  ;;  %1069 = vrot.lane.b32.xlu2 %v1714_v21, %s1806_s2  ;;  %v4204_v47 = vld [vmem:[#allocation6_spill] sm:$0xff]  ;;  %p1739_p0 = pneg %p1738_p13 }
 0x254   : > { %1067 = vrot.lane.b32.xlu1 %v1715_v46, %s1806_s2  ;;  %v4206_v46 = vld [vmem:[#allocation10_spill] sm:$0xff] }
 0x255   : > { %v950_v44 = vpop.permute.xlu0 %949  ;;  %v972_v48 = vpop.permute.xlu2 %971  ;;  %p1744_p5 = pnand %p1743_p3, %p1739_p0 }
 0x256   : > { %v3390_v29 = vsel %vm1381_vm7, %v1360_v35, %v950_v44  ;;  %v952_v16 = vpop.permute.xlu1 %951  ;;  %v3394_v54 = vsel %vm1381_vm7, %v3134_v28, %v972_v48  ;;  %v4208_v44 = vld [vmem:[#allocation12_spill] sm:$0xff]  ;;  %v4209_v48 = vld [vmem:[#allocation14_spill] sm:$0xff] }
 0x257   : > { %v3397_v2 = vsel %vm1381_vm7, %v1361_v1, %v952_v16 }
 0x25b   : > { %1071 = vrot.lane.b32.xlu0 %v1716_v43, %s1806_s2  ;;  %1075 = vrot.lane.b32.xlu2 %v1717_v24, %s1806_s2  ;;  %v4211_v24 = vld [vmem:[#allocation16_spill] sm:$0xff] }
 0x25c   : > { %1073 = vrot.lane.b32.xlu1 %v1718_v60, %s1806_s2  ;;  %v4212_v60 = vld [vmem:[#allocation20_spill] sm:$0xff] }
 0x25d   : > { %v956_v56 = vpop.permute.xlu0 %955  ;;  %v978_v10 = vpop.permute.xlu2 %977 }
 0x25e   : > { %v3407_v42 = vsel %vm1381_vm7, %v3023_v20, %v956_v56  ;;  %v958_v28 = vpop.permute.xlu1 %957  ;;  %v3411_v11 = vsel %vm1381_vm7, %v3179_v63, %v978_v10  ;;  %v4213_v56 = vld [vmem:[#allocation15_spill] sm:$0xff] }
 0x25f   : > { %v3415_v14 = vsel %vm1381_vm7, %v4200_v61, %v958_v28 }
 0x263   : > { %1077 = vrot.lane.b32.xlu0 %v1719_v30, %s1806_s2  ;;  %1081 = vrot.lane.b32.xlu2 %v4201_v58, %s1806_s2  ;;  %v4214_v30 = vld [vmem:[#allocation22_spill] sm:$0xff] }
 0x264   : > { %1079 = vrot.lane.b32.xlu1 %v4202_v27, %s1806_s2 }
 0x265   : > { %v962_v20 = vpop.permute.xlu0 %961  ;;  %v984_v8 = vpop.permute.xlu2 %983 }
 0x266   : > { %v3425_v5 = vsel %vm1381_vm7, %v3065_v23, %v962_v20  ;;  %v964_v63 = vpop.permute.xlu1 %963  ;;  %v3429_v12 = vsel %vm1381_vm7, %v3223_v53, %v984_v8 }
 0x267   : > { %v3433_v45 = vsel %vm1381_vm7, %v4203_v17, %v964_v63  ;;  %v4217_v63 = vld [vmem:[#allocation28_spill] sm:$0xff] }
 0x268   : > { %v4218_v17 = vld [vmem:[#allocation32_spill] sm:$0xff] }
 0x26b   : > { %1083 = vrot.lane.b32.xlu0 %v4202_v27, %s1806_s2  ;;  %1120 = vrot.lane.b32.xlu2 %v4204_v47, %s1807_s3  ;;  %v4216_v27 = vld [vmem:[#allocation21_spill] sm:$0xff]  ;;  %v4219_v47 = vld [vmem:[#allocation27_spill] sm:$0xff] }
 0x26c   : > { %1085 = vrot.lane.b32.xlu1 %v4201_v58, %s1806_s2  ;;  %v4215_v58 = vld [vmem:[#allocation26_spill] sm:$0xff] }
 0x26d   : > { %v968_v23 = vpop.permute.xlu0 %967  ;;  %v990_v21 = vpop.permute.xlu2 %989 }
 0x26e   : > { %v3443_v53 = vsel %vm1381_vm7, %v3107_v26, %v968_v23  ;;  %v970_v39 = vpop.permute.xlu1 %969  ;;  %v3447_v13 = vsel %vm1381_vm7, %v3258_v62, %v990_v21 }
 0x26f   : > { %v3451_v41 = vsel %vm1381_vm7, %v2981_v51, %v970_v39 }
 0x273   : > { %1122 = vrot.lane.b32.xlu0 %v4205_v52, %s1807_s3  ;;  %1126 = vrot.lane.b32.xlu2 %v4206_v46, %s1807_s3  ;;  %v4220_v52 = vld [vmem:[#allocation34_spill] sm:$0xff] }
 0x274   : > { %1124 = vrot.lane.b32.xlu1 %v4207_v31, %s1807_s3  ;;  %v4221_v46 = vld [vmem:[#allocation38_spill] sm:$0xff]  ;;  %v4222_v31 = vld [vmem:[#allocation33_spill] sm:$0xff] }
 0x275   : > { %v974_v26 = vpop.permute.xlu0 %973  ;;  %v1028_v7 = vpop.permute.xlu2 %1027 }
 0x276   : > { %v1405_v62 = vsel %vm1381_vm7, %v3141_v19, %v974_v26  ;;  %v976_v49 = vpop.permute.xlu1 %975  ;;  %v3463_v51 = vsel %vm1414_vm8, %v3275_v32, %v1028_v7 }
 0x277   : > { %v3467_v35 = vsel %vm1381_vm7, %v3020_v40, %v976_v49 }
 0x27b   : > { %1128 = vrot.lane.b32.xlu0 %v4208_v44, %s1807_s3  ;;  %1132 = vrot.lane.b32.xlu2 %v4209_v48, %s1807_s3  ;;  %v4223_v44 = vld [vmem:[#allocation40_spill] sm:$0xff] }
 0x27c   : > { %1130 = vrot.lane.b32.xlu1 %v4210_v0, %s1807_s3  ;;  %v4224_v48 = vld [vmem:[#allocation44_spill] sm:$0xff]  ;;  %v4225_v0 = vld [vmem:[#allocation39_spill] sm:$0xff] }
 0x27d   : > { %v980_v1 = vpop.permute.xlu0 %979  ;;  %v1034_v19 = vpop.permute.xlu2 %1033 }
 0x27e   : > { %v1408_v16 = vsel %vm1381_vm7, %v3185_v50, %v980_v1  ;;  %v982_v32 = vpop.permute.xlu1 %981  ;;  %v3479_v43 = vsel %vm1414_vm8, %v3314_v4, %v1034_v19 }
 0x27f   : > { %v3483_v40 = vsel %vm1381_vm7, %v3062_v38, %v982_v32 }
 0x283   : > { %1134 = vrot.lane.b32.xlu0 %v4211_v24, %s1807_s3  ;;  %1138 = vrot.lane.b32.xlu2 %v4212_v60, %s1807_s3  ;;  %v4226_v24 = vld [vmem:[#allocation46_spill] sm:$0xff] }
 0x284   : > { %1136 = vrot.lane.b32.xlu1 %v4213_v56, %s1807_s3  ;;  %v4227_v60 = vld [vmem:[#allocation50_spill] sm:$0xff]  ;;  %v4228_v56 = vld [vmem:[#allocation45_spill] sm:$0xff] }
 0x285   : > { %v986_v10 = vpop.permute.xlu0 %985  ;;  %v1040_v50 = vpop.permute.xlu2 %1039 }
 0x286   : > { %v1411_v28 = vsel %vm1381_vm7, %v3229_v3, %v986_v10  ;;  %v988_v4 = vpop.permute.xlu1 %987  ;;  %v3495_v61 = vsel %vm1414_vm8, %v3352_v55, %v1040_v50 }
 0x287   : > { %v3499_v38 = vsel %vm1381_vm7, %v3104_v22, %v988_v4 }
 0x28b   : > { %1140 = vrot.lane.b32.xlu0 %v4214_v30, %s1807_s3  ;;  %1144 = vrot.lane.b32.xlu2 %v4215_v58, %s1807_s3  ;;  %v4230_v58 = vld [vmem:[#allocation56_spill] sm:$0xff] }
 0x28c   : > { %1142 = vrot.lane.b32.xlu1 %v4216_v27, %s1807_s3  ;;  %v4231_v27 = vld [vmem:[#allocation51_spill] sm:$0xff] }
 0x28d   : > { %v1024_v20 = vpop.permute.xlu0 %1023  ;;  %v1046_v3 = vpop.permute.xlu2 %1045 }
 0x28e   : > { %v1026_v8 = vpop.permute.xlu1 %1025  ;;  %v3509_v55 = vsel %vm1414_vm8, %v3390_v29, %v1046_v3 }
 0x28f   : > { %v3513_v22 = vsel %vm1414_vm8, %v3138_v15, %v1026_v8 }
 0x293   : > { %1146 = vrot.lane.b32.xlu0 %v4217_v63, %s1807_s3  ;;  %1150 = vrot.lane.b32.xlu2 %v4218_v17, %s1807_s3  ;;  %v4232_v17 = vld [vmem:[#allocation140_spill] sm:$0xff] }
 0x294   : > { %1148 = vrot.lane.b32.xlu1 %v4219_v47, %s1807_s3  ;;  %v4233_v47 = vld [vmem:[#allocation142_spill] sm:$0xff] }
 0x295   : > { %v1030_v23 = vpop.permute.xlu0 %1029  ;;  %v1052_v21 = vpop.permute.xlu2 %1051 }
 0x296   : > { %v1032_v39 = vpop.permute.xlu1 %1031  ;;  %v3523_v29 = vsel %vm1414_vm8, %v3407_v42, %v1052_v21 }
 0x297   : > { %v3527_v15 = vsel %vm1414_vm8, %v3182_v33, %v1032_v39 }
 0x29b   : > { %1152 = vrot.lane.b32.xlu0 %v4220_v52, %s1807_s3  ;;  %1156 = vrot.lane.b32.xlu2 %v4221_v46, %s1807_s3 }
 0x29c   : > { %1154 = vrot.lane.b32.xlu1 %v4222_v31, %s1807_s3 }
 0x29d   : > { %v1036_v26 = vpop.permute.xlu0 %1035  ;;  %v1058_v7 = vpop.permute.xlu2 %1057 }
 0x29e   : > { %v1038_v49 = vpop.permute.xlu1 %1037  ;;  %v3537_v42 = vsel %vm1414_vm8, %v3425_v5, %v1058_v7 }
 0x29f   : > { %v3541_v33 = vsel %vm1414_vm8, %v3226_v6, %v1038_v49 }
 0x2a3   : > { %1158 = vrot.lane.b32.xlu0 %v4223_v44, %s1807_s3  ;;  %1162 = vrot.lane.b32.xlu2 %v4224_v48, %s1807_s3 }
 0x2a4   : > { %1160 = vrot.lane.b32.xlu1 %v4225_v0, %s1807_s3 }
 0x2a5   : > { %v1042_v1 = vpop.permute.xlu0 %1041  ;;  %v1064_v19 = vpop.permute.xlu2 %1063 }
 0x2a6   : > { %v1044_v32 = vpop.permute.xlu1 %1043  ;;  %v3551_v5 = vsel %vm1414_vm8, %v3443_v53, %v1064_v19  ;;  %v1421_v19 = vsel %vm1414_vm8, %v3321_v25, %v1036_v26 }
 0x2a7   : > { %v3555_v6 = vsel %vm1414_vm8, %v3261_v59, %v1044_v32  ;;  %v4229_v59 = vld [vmem:[#allocation52_spill] sm:$0xff] }
 0x2ab   : > { %1164 = vrot.lane.b32.xlu0 %v4226_v24, %s1807_s3  ;;  %1168 = vrot.lane.b32.xlu2 %v4227_v60, %s1807_s3 }
 0x2ac   : > { %1166 = vrot.lane.b32.xlu1 %v4228_v56, %s1807_s3 }
 0x2ad   : > { %v1048_v10 = vpop.permute.xlu0 %1047  ;;  %v1070_v50 = vpop.permute.xlu2 %1069 }
 0x2ae   : > { %v1050_v4 = vpop.permute.xlu1 %1049  ;;  %v3564_v30 = vsel %vm1414_vm8, %v1405_v62, %v1070_v50 }
 0x2af   : > { %v3568_v53 = vsel %vm1414_vm8, %v3279_v37, %v1050_v4 }
 0x2b3   : > { %1170 = vrot.lane.b32.xlu0 %v4229_v59, %s1807_s3  ;;  %1174 = vrot.lane.b32.xlu2 %v4230_v58, %s1807_s3 }
 0x2b4   : > { %1172 = vrot.lane.b32.xlu1 %v4231_v27, %s1807_s3 }
 0x2b5   : > { %v1054_v3 = vpop.permute.xlu0 %1053  ;;  %v1076_v8 = vpop.permute.xlu2 %1075 }
 0x2b6   : > { %v1056_v63 = vpop.permute.xlu1 %1055  ;;  %v3577_v62 = vsel %vm1414_vm8, %v1408_v16, %v1076_v8  ;;  %v1415_v16 = vsel %vm1414_vm8, %v3265_v34, %v1024_v20 }
 0x2b7   : > { %v3581_v37 = vsel %vm1414_vm8, %v3318_v36, %v1056_v63 }
 0x2bb   : > { %1176 = vrot.lane.b32.xlu0 %v4232_v17, %s1807_s3  ;;  %1180 = vrot.lane.b32.xlu2 %v4232_v17, %s1807_s3 }
 0x2bc   : > { %1178 = vrot.lane.b32.xlu1 %v4233_v47, %s1807_s3 }
 0x2bd   : > { %v1060_v21 = vpop.permute.xlu0 %1059  ;;  %v1082_v39 = vpop.permute.xlu2 %1081 }
 0x2be   : > { %v1062_v52 = vpop.permute.xlu1 %1061  ;;  %v3590_v46 = vsel %vm1414_vm8, %v1411_v28, %v1082_v39 }
 0x2bf   : > { %v3595_v36 = vsel %vm1414_vm8, %v3356_v18, %v1062_v52  ;;  %v1418_v18 = vsel %vm1414_vm8, %v3283_v9, %v1030_v23 }
 0x2c3   : > { %1182 = vrot.lane.b32.xlu0 %v4233_v47, %s1807_s3 }
 0x2c5   : > { %v1066_v31 = vpop.permute.xlu0 %1065  ;;  %v1121_v7 = vpop.permute.xlu2 %1120 }
 0x2c6   : > { %v1068_v49 = vpop.permute.xlu1 %1067  ;;  %v1448_v28 = vsel %vm1447_vm9, %v1415_v16, %v1121_v7 }
 0x2c7   : > { %v3606_v44 = vsel %vm1414_vm8, %v3394_v54, %v1068_v49  ;;  %1481 = vst.msk [vmem:[%s3608_s12] sm:$0xff] %vm1480_vm10, %v1448_v28 }
 0x2cd   : > { %v1072_v34 = vpop.permute.xlu0 %1071  ;;  %v1127_v20 = vpop.permute.xlu2 %1126 }
 0x2ce   : > { %v1074_v48 = vpop.permute.xlu1 %1073  ;;  %v1451_v0 = vsel %vm1447_vm9, %v1418_v18, %v1127_v20 }
 0x2cf   : > { %v3617_v54 = vsel %vm1414_vm8, %v3411_v11, %v1074_v48  ;;  %1484 = vst.msk [vmem:[%s3608_s12 + $0x18] sm:$0xff] %vm1480_vm10, %v1451_v0  ;;  %v1424_v11 = vsel %vm1414_vm8, %v3359_v57, %v1042_v1 }
 0x2d5   : > { %v3623_v32 = vpop.permute.xlu0 %1077  ;;  %v1133_v24 = vpop.permute.xlu2 %1132 }
 0x2d6   : > { %v1080_v60 = vpop.permute.xlu1 %1079  ;;  %v1454_v9 = vsel %vm1447_vm9, %v1421_v19, %v1133_v24 }
 0x2d7   : > { %v3628_v23 = vsel %vm1414_vm8, %v3429_v12, %v1080_v60  ;;  %1487 = vst.msk [vmem:[%s3608_s12 + $0x30] sm:$0xff] %vm1480_vm10, %v1454_v9  ;;  %v1427_v12 = vsel %vm1414_vm8, %v3397_v2, %v1048_v10  ;;  %v1430_v2 = vsel %vm1414_vm8, %v3415_v14, %v1054_v3  ;;  %v1433_v14 = vsel %vm1414_vm8, %v3433_v45, %v1060_v21 }
 0x2d8   : > { %v1436_v45 = vsel %vm1414_vm8, %v3451_v41, %v1066_v31  ;;  %v1439_v41 = vsel %vm1414_vm8, %v3467_v35, %v1072_v34  ;;  %v1442_v35 = vsel %vm1414_vm8, %v3483_v40, %v3623_v32 }
 0x2dd   : > { %v3634_v56 = vpop.permute.xlu0 %1083  ;;  %v1139_v25 = vpop.permute.xlu2 %1138 }
 0x2de   : > { %v1086_v26 = vpop.permute.xlu1 %1085  ;;  %v1457_v50 = vsel %vm1447_vm9, %v1424_v11, %v1139_v25  ;;  %v1445_v40 = vsel %vm1414_vm8, %v3499_v38, %v3634_v56 }
 0x2df   : > { %v3639_v4 = vsel %vm1414_vm8, %v3447_v13, %v1086_v26  ;;  %1490 = vst.msk [vmem:[%s3608_s12 + $0x48] sm:$0xff] %vm1480_vm10, %v1457_v50 }
 0x2e5   : > { %v1123_v59 = vpop.permute.xlu0 %1122  ;;  %v1145_v58 = vpop.permute.xlu2 %1144 }
 0x2e6   : > { %v1449_v57 = vsel %vm1447_vm9, %v3513_v22, %v1123_v59  ;;  %v1125_v1 = vpop.permute.xlu1 %1124  ;;  %v1460_v27 = vsel %vm1447_vm9, %v1427_v12, %v1145_v58 }
 0x2e7   : > { %1482 = vst.msk [vmem:[%s3608_s12 + $0x8] sm:$0xff] %vm1480_vm10, %v1449_v57  ;;  %v1450_v13 = vsel %vm1447_vm9, %v3463_v51, %v1125_v1 }
 0x2e8   : > { %1483 = vst.msk [vmem:[%s3608_s12 + $0x10] sm:$0xff] %vm1480_vm10, %v1450_v13 }
 0x2e9   : > { %1493 = vst.msk [vmem:[%s3608_s12 + $0x60] sm:$0xff] %vm1480_vm10, %v1460_v27 }
 0x2ed   : > { %v1129_v10 = vpop.permute.xlu0 %1128  ;;  %v1151_v8 = vpop.permute.xlu2 %1150 }
 0x2ee   : > { %v1452_v22 = vsel %vm1447_vm9, %v3527_v15, %v1129_v10  ;;  %v1131_v63 = vpop.permute.xlu1 %1130  ;;  %v1463_v17 = vsel %vm1447_vm9, %v1430_v2, %v1151_v8 }
 0x2ef   : > { %1485 = vst.msk [vmem:[%s3608_s12 + $0x20] sm:$0xff] %vm1480_vm10, %v1452_v22  ;;  %v1453_v51 = vsel %vm1447_vm9, %v3479_v43, %v1131_v63 }
 0x2f0   : > { %1486 = vst.msk [vmem:[%s3608_s12 + $0x28] sm:$0xff] %vm1480_vm10, %v1453_v51 }
 0x2f1   : > { %1496 = vst.msk [vmem:[%s3608_s12 + $0x78] sm:$0xff] %vm1480_vm10, %v1463_v17 }
 0x2f5   : > { %v1135_v3 = vpop.permute.xlu0 %1134  ;;  %v1157_v47 = vpop.permute.xlu2 %1156 }
 0x2f6   : > { %v1455_v15 = vsel %vm1447_vm9, %v3541_v33, %v1135_v3  ;;  %v1137_v39 = vpop.permute.xlu1 %1136  ;;  %v1466_v52 = vsel %vm1447_vm9, %v1433_v14, %v1157_v47 }
 0x2f7   : > { %1488 = vst.msk [vmem:[%s3608_s12 + $0x38] sm:$0xff] %vm1480_vm10, %v1455_v15  ;;  %v1456_v43 = vsel %vm1447_vm9, %v3495_v61, %v1137_v39 }
 0x2f8   : > { %1489 = vst.msk [vmem:[%s3608_s12 + $0x40] sm:$0xff] %vm1480_vm10, %v1456_v43 }
 0x2f9   : > { %1499 = vst.msk [vmem:[%s3608_s12 + $0x90] sm:$0xff] %vm1480_vm10, %v1466_v52 }
 0x2fd   : > { %v1141_v21 = vpop.permute.xlu0 %1140  ;;  %v1163_v16 = vpop.permute.xlu2 %1162 }
 0x2fe   : > { %v1458_v33 = vsel %vm1447_vm9, %v3555_v6, %v1141_v21  ;;  %v1143_v7 = vpop.permute.xlu1 %1142  ;;  %v1469_v49 = vsel %vm1447_vm9, %v1436_v45, %v1163_v16 }
 0x2ff   : > { %1491 = vst.msk [vmem:[%s3608_s12 + $0x50] sm:$0xff] %vm1480_vm10, %v1458_v33  ;;  %v1459_v61 = vsel %vm1447_vm9, %v3509_v55, %v1143_v7 }
 0x300   : > { %1492 = vst.msk [vmem:[%s3608_s12 + $0x58] sm:$0xff] %vm1480_vm10, %v1459_v61 }
 0x301   : > { %1502 = vst.msk [vmem:[%s3608_s12 + $0xa8] sm:$0xff] %vm1480_vm10, %v1469_v49 }
 0x305   : > { %v1147_v31 = vpop.permute.xlu0 %1146  ;;  %v1169_v28 = vpop.permute.xlu2 %1168 }
 0x306   : > { %v1461_v6 = vsel %vm1447_vm9, %v3568_v53, %v1147_v31  ;;  %v1149_v18 = vpop.permute.xlu1 %1148  ;;  %v1472_v20 = vsel %vm1447_vm9, %v1439_v41, %v1169_v28 }
 0x307   : > { %1494 = vst.msk [vmem:[%s3608_s12 + $0x68] sm:$0xff] %vm1480_vm10, %v1461_v6  ;;  %v1462_v55 = vsel %vm1447_vm9, %v3523_v29, %v1149_v18 }
 0x308   : > { %1495 = vst.msk [vmem:[%s3608_s12 + $0x70] sm:$0xff] %vm1480_vm10, %v1462_v55 }
 0x309   : > { %1505 = vst.msk [vmem:[%s3608_s12 + $0xc0] sm:$0xff] %vm1480_vm10, %v1472_v20 }
 0x30d   : > { %v1153_v34 = vpop.permute.xlu0 %1152  ;;  %v1175_v53 = vpop.permute.xlu2 %1174 }
 0x30e   : > { %v1464_v48 = vsel %vm1447_vm9, %v3581_v37, %v1153_v34  ;;  %v1155_v0 = vpop.permute.xlu1 %1154  ;;  %v1475_v19 = vsel %vm1447_vm9, %v1442_v35, %v1175_v53 }
 0x30f   : > { %1497 = vst.msk [vmem:[%s3608_s12 + $0x80] sm:$0xff] %vm1480_vm10, %v1464_v48  ;;  %v1465_v29 = vsel %vm1447_vm9, %v3537_v42, %v1155_v0 }
 0x310   : > { %1498 = vst.msk [vmem:[%s3608_s12 + $0x88] sm:$0xff] %vm1480_vm10, %v1465_v29 }
 0x311   : > { %1508 = vst.msk [vmem:[%s3608_s12 + $0xd8] sm:$0xff] %vm1480_vm10, %v1475_v19 }
 0x315   : > { %v1159_v37 = vpop.permute.xlu0 %1158  ;;  %v1181_v32 = vpop.permute.xlu2 %1180 }
 0x316   : > { %v1467_v24 = vsel %vm1447_vm9, %v3595_v36, %v1159_v37  ;;  %v1161_v60 = vpop.permute.xlu1 %1160  ;;  %v1478_v9 = vsel %vm1447_vm9, %v1445_v40, %v1181_v32 }
 0x317   : > { %1500 = vst.msk [vmem:[%s3608_s12 + $0x98] sm:$0xff] %vm1480_vm10, %v1467_v24  ;;  %v1468_v42 = vsel %vm1447_vm9, %v3551_v5, %v1161_v60 }
 0x318   : > { %1501 = vst.msk [vmem:[%s3608_s12 + $0xa0] sm:$0xff] %vm1480_vm10, %v1468_v42 }
 0x319   : > { %1511 = vst.msk [vmem:[%s3608_s12 + $0xf0] sm:$0xff] %vm1480_vm10, %v1478_v9 }
 0x31d   : > { %v1165_v38 = vpop.permute.xlu0 %1164 }
 0x31e   : > { %v1470_v36 = vsel %vm1447_vm9, %v3606_v44, %v1165_v38  ;;  %v1167_v11 = vpop.permute.xlu1 %1166 }
 0x31f   : > { %1503 = vst.msk [vmem:[%s3608_s12 + $0xb0] sm:$0xff] %vm1480_vm10, %v1470_v36  ;;  %v1471_v56 = vsel %vm1447_vm9, %v3564_v30, %v1167_v11 }
 0x320   : > { %1504 = vst.msk [vmem:[%s3608_s12 + $0xb8] sm:$0xff] %vm1480_vm10, %v1471_v56 }
 0x325   : > { %v1171_v5 = vpop.permute.xlu0 %1170 }
 0x326   : > { %v1473_v25 = vsel %vm1447_vm9, %v3617_v54, %v1171_v5  ;;  %v1173_v26 = vpop.permute.xlu1 %1172 }
 0x327   : > { %1506 = vst.msk [vmem:[%s3608_s12 + $0xc8] sm:$0xff] %vm1480_vm10, %v1473_v25  ;;  %v1474_v44 = vsel %vm1447_vm9, %v3577_v62, %v1173_v26 }
 0x328   : > { %1507 = vst.msk [vmem:[%s3608_s12 + $0xd0] sm:$0xff] %vm1480_vm10, %v1474_v44 }
 0x32d   : > { %v1177_v50 = vpop.permute.xlu0 %1176 }
 0x32e   : > { %v1476_v30 = vsel %vm1447_vm9, %v3628_v23, %v1177_v50  ;;  %v1179_v12 = vpop.permute.xlu1 %1178 }
 0x32f   : > { %1509 = vst.msk [vmem:[%s3608_s12 + $0xe0] sm:$0xff] %vm1480_vm10, %v1476_v30  ;;  %v1477_v54 = vsel %vm1447_vm9, %v3590_v46, %v1179_v12 }
 0x330   : > { %1510 = vst.msk [vmem:[%s3608_s12 + $0xe8] sm:$0xff] %vm1480_vm10, %v1477_v54 }
 0x335   : > { %v1183_v62 = vpop.permute.xlu0 %1182 }
 0x336   : > { %v1479_v23 = vsel %vm1447_vm9, %v3639_v4, %v1183_v62 }
 0x337   : > { %1512 = vst.msk [vmem:[%s3608_s12 + $0xf8] sm:$0xff] %vm1480_vm10, %v1479_v23 }
 0x338   : > { %1747 = shalt.err (!%p1744_p5)
}
 0x339   : > { %s1808_s2 = smov 128  }
 0x33a   : > { %1628 = dma.vmem_to_hbm [thread:$0]  (%p1859_p4), %s1530_s21, 4096, %s1532_s22, %s1514_s9, %s1808_s2, %s1808_s2, %s1801_s26  }
 0x33b PF: > { %p1634_p6 = scmp.ge.s32.totalorder %s1798_s11, 2  ;;  %s1546_s3 = sand.u32 1, %s1778_s6  }
 0x33c   : > { %s1547_s4 = scalar_lea.sflag [#allocation3], %s1546_s3 }
 0x33d   : > { %p1631_p7 = pnand %p1634_p6, %p1866_p8 }
 0x33f   : > { %p1632_p9 = pneg %p1631_p7 }
 0x341   : > { %1773 = dma.done.wait (%p1632_p9), %s1547_s4, 4096  }
 0x342   : > { %1775 = vsyncadd (%p1632_p9), %s1547_s4, 4294963200  ;;  %s14_s11 = sadd.s32 1, %s1798_s11   ;;  %s4234_s6 = smov %s1782_s7 }
 0x343   : > { %p11_p10 = scmp.ge.s32.totalorder %s14_s11, 4   ;;  %s4235_s7 = smov %s1786_s8 }
 0x344   : > { %s4236_s8 = smov %s1872_s19  ;;  %s4237_s9 = smov %s1794_s10 }
 0x345   : > { %s4238_s10 = smov %s4240_s14  ;;  %13 = sbr.rel (!%p11_p10) target bundleno = 4 (0x4), region = 62 }
 0x34a   :  { %1553 = vsyncpa [#allocation3], 1 }
 0x34b   :  { %1555 = vsyncpa [#allocation3 + $0x1], 1 }

</bundles_post_ra>
